<compile_context>
chip_gen: v5e
topology: v5e:2x2
jax: 0.10.0
libtpu: 0.0.40
codegen_flags: <defaults>
</compile_context>

<pallas_src>
import functools

import jax
import jax.numpy as jnp
from jax.experimental import pallas as pl
from jax.experimental.pallas import tpu as pltpu


def _round_up(n, m):
    return ((n + m - 1) // m) * m


def _gelu(y):
    # exact GELU (erf form), matches torch.nn.GELU(approximate='none')
    return 0.5 * y * (1.0 + jax.lax.erf(y * 0.7071067811865476))


# ----------------------------- Pallas kernel ------------------------------ #
def _patch_embed_kernel(lhs_ref, mask_ref, w1_ref, s1_ref, w2_ref, s2_ref,
                        o_ref, act_ref, acc2_ref,
                        *, Mph, Wp2, Ho2, Wo2, M2c):
    # ---- Stage 1: conv1 (3x3, s2, p1) + BN + GELU as ONE bf16 MXU matmul.
    # lhs rows are already ordered as the 4 zero-ring-padded polyphase
    # components of conv1's output plane (pad/slack rows have mask 0), so the
    # masked GELU result is exactly the conv2 staging buffer: one store, no
    # scatter, no memset, no deinterleave.
    y1 = jnp.dot(lhs_ref[0], w1_ref[...], preferred_element_type=jnp.float32)
    act_ref[...] = (_gelu(y1 + s1_ref[...]) * mask_ref[...]).astype(act_ref.dtype)

    # ---- Stage 2: conv2 (3x3, s2, p1): 9 accumulating bf16 matmuls, f32 acc.
    # Tap (kh, kw) is a contiguous row-slice (free ref view) of phase
    # (kh % 2, kw % 2); offsets are compile-time constants.
    for kh in range(3):
        for kw in range(3):
            t = kh * 3 + kw
            off = ((kh % 2) * 2 + (kw % 2)) * Mph + (kh // 2) * Wp2 + (kw // 2)
            contrib = jnp.dot(act_ref[off:off + M2c, :], w2_ref[t],
                              preferred_element_type=jnp.float32)
            if t == 0:
                acc2_ref[...] = contrib
            else:
                acc2_ref[...] += contrib

    # ---- Epilogue: BN shift + GELU on ref-views, drop the one garbage
    # column per output row, store bf16 lane-dense.
    s2 = s2_ref[...]
    for h2 in range(Ho2):
        blk = acc2_ref[h2 * Wp2:h2 * Wp2 + Wo2, :]
        o_ref[0, h2 * Wo2:(h2 + 1) * Wo2, :] = _gelu(blk + s2).astype(o_ref.dtype)


# ------------------------------ JAX glue ---------------------------------- #
def _fold_bn(gamma, beta, running_mean, running_var, eps=1e-5):
    scale = gamma / jnp.sqrt(running_var + eps)
    shift = beta - running_mean * scale
    return scale, shift


def _prep_conv_weights(w_oihw, bn, cin_pad, cout_pad):
    """(Cout, Cin, 3, 3) + BN -> w (9, cin_pad, cout_pad) bf16, shift (1, cout_pad) f32."""
    cout, cin, _, _ = w_oihw.shape
    scale, shift = _fold_bn(*bn)
    w = jnp.transpose(w_oihw, (2, 3, 1, 0)) * scale[None, None, None, :]
    w = jnp.pad(w, ((0, 0), (0, 0), (0, cin_pad - cin), (0, cout_pad - cout)))
    w = w.reshape(9, cin_pad, cout_pad).astype(jnp.bfloat16)
    shift = jnp.pad(shift, (0, cout_pad - cout)).reshape(1, cout_pad).astype(jnp.float32)
    return w, shift


def _prep_conv1_lhs(x_nchw, cin_pad, Mph):
    """Phase-ordered conv1 im2col (cheap: Cin is only 3-4).

    Returns
      lhs  (B, 4*Mph, 9*cin_pad) bf16: rows ordered as the 4 polyphase
           components of conv1's zero-ring-padded output plane, each flattened
           row-major with row width Wp2 = W//4 + 1 and padded to Mph rows.
      mask (4*Mph, 1) f32: 1 for real conv1 output pixels, 0 for the
           zero-ring / slack rows (applied post-GELU in the kernel).
    """
    B, C, H, W = x_nchw.shape
    Ho1, Wo1 = H // 2, W // 2
    Hp, Wp2 = H // 4 + 1, W // 4 + 1
    K1 = 9 * cin_pad

    x = jnp.transpose(x_nchw, (0, 2, 3, 1))                          # NHWC
    x = jnp.pad(x, ((0, 0), (1, 1), (1, 1), (0, cin_pad - C)))
    taps = [x[:, kh:kh + 2 * Ho1:2, kw:kw + 2 * Wo1:2, :]
            for kh in range(3) for kw in range(3)]
    cols = jnp.stack(taps, axis=3).reshape(B, Ho1, Wo1, K1)          # im2col
    cols = jnp.pad(cols, ((0, 0), (1, 1), (1, 1), (0, 0)))           # zero ring
    ring = jnp.pad(jnp.ones((Ho1, Wo1), jnp.float32), ((1, 1), (1, 1)))

    lhs_p, msk_p = [], []
    for a in range(2):
        for b in range(2):
            ph = cols[:, a::2, b::2, :].reshape(B, Hp * Wp2, K1)
            lhs_p.append(jnp.pad(ph, ((0, 0), (0, Mph - Hp * Wp2), (0, 0))))
            mk = ring[a::2, b::2].reshape(Hp * Wp2)
            msk_p.append(jnp.pad(mk, (0, Mph - Hp * Wp2)))
    lhs = jnp.concatenate(lhs_p, axis=1).astype(jnp.bfloat16)
    mask = jnp.concatenate(msk_p).reshape(4 * Mph, 1)
    return lhs, mask


def patch_embed_forward(x_nchw, params):
    """x_nchw: (B, C, H, W) -> (B, (H//4)*(W//4), embed_dim), bf16."""
    B, Cin, H, W = x_nchw.shape
    assert H % 4 == 0 and W % 4 == 0, "PatchEmbed(sub_num=2) needs H, W % 4 == 0"
    Cmid = params["w1"].shape[0]
    D = params["w2"].shape[0]

    Cin_p = _round_up(Cin, 8)
    Cmid_p = _round_up(Cmid, 128)
    Dp = _round_up(D, 128)                       # lane-dense stores

    Ho2, Wo2 = H // 4, W // 4
    Hp, Wp2 = Ho2 + 1, Wo2 + 1                   # padded polyphase plane dims
    Mph = _round_up(Hp * Wp2 + 1, 8)             # +1 slack for last-tap overread
    M1t = 4 * Mph                                # conv1 matmul M (all 4 phases)
    K1 = 9 * Cin_p                               # fused conv1 contraction dim
    M2c = Ho2 * Wp2                              # conv2 rows (1 garbage col/row)
    P = Ho2 * Wo2

    lhs, mask = _prep_conv1_lhs(x_nchw, Cin_p, Mph)
    w1, s1 = _prep_conv_weights(params["w1"], params["bn1"], Cin_p, Cmid_p)
    w1 = w1.reshape(K1, Cmid_p)                  # single K = 9*Cin_p matmul
    w2, s2 = _prep_conv_weights(params["w2"], params["bn2"], Cmid_p, Dp)

    # Per-step VMEM working set (double-buffered blocks, weights, scratch,
    # f32 intermediates), with 2x headroom; capped for v7x's 64 MiB.
    est = (2 * M1t * K1 * 2 + M1t * 4
           + 2 * (K1 * Cmid_p * 2 + Cmid_p * 4 + 9 * Cmid_p * Dp * 2 + Dp * 4)
           + M1t * Cmid_p * (4 + 2)
           + 2 * M2c * Dp * 4
           + 2 * P * Dp * 2)
    vmem_limit = int(min(max(2 * est, 8 << 20), 64 << 20))

    kernel = functools.partial(
        _patch_embed_kernel, Mph=Mph, Wp2=Wp2, Ho2=Ho2, Wo2=Wo2, M2c=M2c)

    out = pl.pallas_call(
        kernel,
        out_shape=jax.ShapeDtypeStruct((B, P, Dp), jnp.bfloat16),
        grid=(B,),
        in_specs=[
            pl.BlockSpec((1, M1t, K1), lambda b: (b, 0, 0)),
            pl.BlockSpec((M1t, 1), lambda b: (0, 0)),
            pl.BlockSpec((K1, Cmid_p), lambda b: (0, 0)),
            pl.BlockSpec((1, Cmid_p), lambda b: (0, 0)),
            pl.BlockSpec((9, Cmid_p, Dp), lambda b: (0, 0, 0)),
            pl.BlockSpec((1, Dp), lambda b: (0, 0)),
        ],
        out_specs=pl.BlockSpec((1, P, Dp), lambda b: (b, 0, 0)),
        scratch_shapes=[
            pltpu.VMEM((M1t, Cmid_p), jnp.bfloat16),   # staged conv1 act (4 phases)
            pltpu.VMEM((M2c, Dp), jnp.float32),        # conv2 f32 accumulator
        ],
        compiler_params=pltpu.CompilerParams(
            dimension_semantics=("parallel",),
            vmem_limit_bytes=vmem_limit),
    )(lhs, mask, w1, s1, w2, s2)

    # Lane padding (if any) dropped here for module-faithful output shape;
    # fused consumers should take the padded (B, P, Dp) array directly.
    return out if Dp == D else out[:, :, :D]


# ------------------------ Plain-JAX reference (f32) ------------------------ #
def reference_forward(x_nchw, params):
    def conv_bn_gelu(x, w, bn):
        y = jax.lax.conv_general_dilated(
            x, w, window_strides=(2, 2), padding=((1, 1), (1, 1)),
            dimension_numbers=("NCHW", "OIHW", "NCHW"))
        gamma, beta, mean, var = bn
        scale = gamma / jnp.sqrt(var + 1e-5)
        shift = beta - mean * scale
        y = y * scale[None, :, None, None] + shift[None, :, None, None]
        return _gelu(y)

    y = conv_bn_gelu(x_nchw, params["w1"], params["bn1"])
    y = conv_bn_gelu(y, params["w2"], params["bn2"])
    B, D, Ho, Wo = y.shape
    return jnp.transpose(y.reshape(B, D, Ho * Wo), (0, 2, 1))


# --------------------------- Parameter init -------------------------------- #
def make_params(key, in_channels, embed_dim):
    mid = embed_dim // 2
    k = jax.random.split(key, 4)

    def bn(kk, n):
        k1, k2, k3, k4 = jax.random.split(kk, 4)
        gamma = 1.0 + 0.1 * jax.random.normal(k1, (n,), jnp.float32)
        beta = 0.1 * jax.random.normal(k2, (n,), jnp.float32)
        rmean = 0.05 * jax.random.normal(k3, (n,), jnp.float32)
        rvar = 1.0 + 0.1 * jnp.abs(jax.random.normal(k4, (n,), jnp.float32))
        return (gamma, beta, rmean, rvar)

    return {
        "w1": 0.05 * jax.random.normal(k[0], (mid, in_channels, 3, 3), jnp.float32),
        "bn1": bn(k[1], mid),
        "w2": 0.05 * jax.random.normal(k[2], (embed_dim, mid, 3, 3), jnp.float32),
        "bn2": bn(k[3], embed_dim),
    }


# ---------------------------------- Main ----------------------------------- #
if __name__ == "__main__":
    B, C, H, W = 2, 4, 16, 16     # small img_size=(16,16), in_channels=4
    EMBED_DIM = 64                # small embed_dim (sub_num=2)

    key = jax.random.PRNGKey(0)
    kx, kp = jax.random.split(key)
    x = jax.random.normal(kx, (B, C, H, W), jnp.float32)
    params = make_params(kp, C, EMBED_DIM)

    fwd = jax.jit(functools.partial(patch_embed_forward, params=params))
    out = fwd(x)
    jax.block_until_ready(out)

    expected = (B, (H // 4) * (W // 4), EMBED_DIM)
    assert out.shape == expected, (out.shape, expected)

    ref = reference_forward(x, params)
    err = float(jnp.max(jnp.abs(out.astype(jnp.float32) - ref)))
    assert err < 2e-2, f"max abs error vs reference: {err}"
    print("KERNEL_OK")
</pallas_src>

<mosaic_0001>
module attributes {stable_mosaic.version = 11 : i64} {
  func.func @_patch_embed_kernel(%arg0: i32, %arg1: memref<1x128x72xbf16, #tpu.memory_space<vmem>>, %arg2: memref<128x1xf32, #tpu.memory_space<vmem>>, %arg3: memref<72x128xbf16, #tpu.memory_space<vmem>>, %arg4: memref<1x128xf32, #tpu.memory_space<vmem>>, %arg5: memref<9x128x128xbf16, #tpu.memory_space<vmem>>, %arg6: memref<1x128xf32, #tpu.memory_space<vmem>>, %arg7: memref<1x16x128xbf16, #tpu.memory_space<vmem>>, %arg8: memref<128x128xbf16, #tpu.memory_space<vmem>>, %arg9: memref<20x128xf32, #tpu.memory_space<vmem>>) attributes {dimension_semantics = [#tpu.dimension_semantics<parallel>], iteration_bounds = array<i64: 2>, scalar_prefetch = 0 : i64, scratch_operands = 2 : i64, tpu.core_type = #tpu.core_type<tc>, window_params = [{transform_indices = @transform_0, window_bounds = array<i64: 1, 128, 72>}, {pipeline_mode = #tpu.pipeline_mode<synchronous>, transform_indices = @transform_1, window_bounds = array<i64: 128, 1>}, {pipeline_mode = #tpu.pipeline_mode<synchronous>, transform_indices = @transform_2, window_bounds = array<i64: 72, 128>}, {pipeline_mode = #tpu.pipeline_mode<synchronous>, transform_indices = @transform_3, window_bounds = array<i64: 1, 128>}, {pipeline_mode = #tpu.pipeline_mode<synchronous>, transform_indices = @transform_4, window_bounds = array<i64: 9, 128, 128>}, {pipeline_mode = #tpu.pipeline_mode<synchronous>, transform_indices = @transform_5, window_bounds = array<i64: 1, 128>}, {transform_indices = @transform_6, window_bounds = array<i64: 1, 16, 128>}]} {
    %c0 = arith.constant 0 : index
    %c0_0 = arith.constant 0 : index
    %c0_1 = arith.constant 0 : index
    %0 = vector.load %arg1[%c0, %c0_0, %c0_1] : memref<1x128x72xbf16, #tpu.memory_space<vmem>>, vector<1x128x72xbf16>
    %1 = vector.shape_cast %0 : vector<1x128x72xbf16> to vector<128x72xbf16>
    %c0_2 = arith.constant 0 : index
    %c0_3 = arith.constant 0 : index
    %2 = vector.load %arg3[%c0_2, %c0_3] : memref<72x128xbf16, #tpu.memory_space<vmem>>, vector<72x128xbf16>
    %cst = arith.constant dense<0.000000e+00> : vector<128x128xf32>
    %3 = tpu.matmul %1, %2, %cst {dimension_numbers = #tpu.dot_dimension_numbers<[1], [0], [0], [1], [0, 0, 1, 1], [], []>} : vector<128x72xbf16>, vector<72x128xbf16>, vector<128x128xf32> -> vector<128x128xf32>
    %c0_4 = arith.constant 0 : index
    %c0_5 = arith.constant 0 : index
    %4 = vector.load %arg4[%c0_4, %c0_5] : memref<1x128xf32, #tpu.memory_space<vmem>>, vector<1x128xf32>
    %5 = vector.broadcast %4 : vector<1x128xf32> to vector<128x128xf32>
    %6 = arith.addf %3, %5 : vector<128x128xf32>
    %cst_6 = arith.constant 5.000000e-01 : f32
    %7 = vector.broadcast %cst_6 : f32 to vector<128x128xf32>
    %8 = arith.mulf %7, %6 : vector<128x128xf32>
    %cst_7 = arith.constant 0.707106769 : f32
    %9 = vector.broadcast %cst_7 : f32 to vector<128x128xf32>
    %10 = arith.mulf %6, %9 : vector<128x128xf32>
    %11 = math.erf %10 : vector<128x128xf32>
    %cst_8 = arith.constant 1.000000e+00 : f32
    %12 = vector.broadcast %cst_8 : f32 to vector<128x128xf32>
    %13 = arith.addf %12, %11 : vector<128x128xf32>
    %14 = arith.mulf %8, %13 : vector<128x128xf32>
    %c0_9 = arith.constant 0 : index
    %c0_10 = arith.constant 0 : index
    %15 = vector.load %arg2[%c0_9, %c0_10] : memref<128x1xf32, #tpu.memory_space<vmem>>, vector<128x1xf32>
    %16 = vector.broadcast %15 : vector<128x1xf32> to vector<128x128xf32>
    %17 = arith.mulf %14, %16 : vector<128x128xf32>
    %18 = arith.truncf %17 : vector<128x128xf32> to vector<128x128xbf16>
    %c0_11 = arith.constant 0 : index
    %c0_12 = arith.constant 0 : index
    %19 = vector.load %arg8[%c0_11, %c0_12] : memref<128x128xbf16, #tpu.memory_space<vmem>>, vector<128x128xbf16>
    tpu.vector_store %arg8[%c0_11, %c0_12], %18 {strides = array<i32>} : memref<128x128xbf16, #tpu.memory_space<vmem>>, vector<128x128xbf16>,
    %c0_13 = arith.constant 0 : index
    %c0_14 = arith.constant 0 : index
    %20 = vector.load %arg8[%c0_13, %c0_14] : memref<128x128xbf16, #tpu.memory_space<vmem>>, vector<20x128xbf16>
    %c0_15 = arith.constant 0 : index
    %c0_16 = arith.constant 0 : index
    %c0_17 = arith.constant 0 : index
    %21 = vector.load %arg5[%c0_15, %c0_16, %c0_17] : memref<9x128x128xbf16, #tpu.memory_space<vmem>>, vector<1x128x128xbf16>
    %22 = vector.shape_cast %21 : vector<1x128x128xbf16> to vector<128x128xbf16>
    %cst_18 = arith.constant dense<0.000000e+00> : vector<20x128xf32>
    %23 = tpu.matmul %20, %22, %cst_18 {dimension_numbers = #tpu.dot_dimension_numbers<[1], [0], [0], [1], [0, 0, 1, 1], [], []>} : vector<20x128xbf16>, vector<128x128xbf16>, vector<20x128xf32> -> vector<20x128xf32>
    %c0_19 = arith.constant 0 : index
    %c0_20 = arith.constant 0 : index
    %24 = vector.load %arg9[%c0_19, %c0_20] : memref<20x128xf32, #tpu.memory_space<vmem>>, vector<20x128xf32>
    tpu.vector_store %arg9[%c0_19, %c0_20], %23 {strides = array<i32>} : memref<20x128xf32, #tpu.memory_space<vmem>>, vector<20x128xf32>,
    %c32 = arith.constant 32 : index
    %c0_21 = arith.constant 0 : index
    %25 = vector.load %arg8[%c32, %c0_21] : memref<128x128xbf16, #tpu.memory_space<vmem>>, vector<20x128xbf16>
    %c1 = arith.constant 1 : index
    %c0_22 = arith.constant 0 : index
    %c0_23 = arith.constant 0 : index
    %26 = vector.load %arg5[%c1, %c0_22, %c0_23] : memref<9x128x128xbf16, #tpu.memory_space<vmem>>, vector<1x128x128xbf16>
    %27 = vector.shape_cast %26 : vector<1x128x128xbf16> to vector<128x128xbf16>
    %cst_24 = arith.constant dense<0.000000e+00> : vector<20x128xf32>
    %28 = tpu.matmul %25, %27, %cst_24 {dimension_numbers = #tpu.dot_dimension_numbers<[1], [0], [0], [1], [0, 0, 1, 1], [], []>} : vector<20x128xbf16>, vector<128x128xbf16>, vector<20x128xf32> -> vector<20x128xf32>
    %c0_25 = arith.constant 0 : index
    %c0_26 = arith.constant 0 : index
    %29 = vector.load %arg9[%c0_25, %c0_26] : memref<20x128xf32, #tpu.memory_space<vmem>>, vector<20x128xf32>
    %30 = arith.addf %29, %28 : vector<20x128xf32>
    %c0_27 = arith.constant 0 : index
    %c0_28 = arith.constant 0 : index
    %31 = vector.load %arg9[%c0_27, %c0_28] : memref<20x128xf32, #tpu.memory_space<vmem>>, vector<20x128xf32>
    tpu.vector_store %arg9[%c0_27, %c0_28], %30 {strides = array<i32>} : memref<20x128xf32, #tpu.memory_space<vmem>>, vector<20x128xf32>,
    %c1_29 = arith.constant 1 : index
    %c0_30 = arith.constant 0 : index
    %32 = vector.load %arg8[%c1_29, %c0_30] : memref<128x128xbf16, #tpu.memory_space<vmem>>, vector<20x128xbf16>
    %c2 = arith.constant 2 : index
    %c0_31 = arith.constant 0 : index
    %c0_32 = arith.constant 0 : index
    %33 = vector.load %arg5[%c2, %c0_31, %c0_32] : memref<9x128x128xbf16, #tpu.memory_space<vmem>>, vector<1x128x128xbf16>
    %34 = vector.shape_cast %33 : vector<1x128x128xbf16> to vector<128x128xbf16>
    %cst_33 = arith.constant dense<0.000000e+00> : vector<20x128xf32>
    %35 = tpu.matmul %32, %34, %cst_33 {dimension_numbers = #tpu.dot_dimension_numbers<[1], [0], [0], [1], [0, 0, 1, 1], [], []>} : vector<20x128xbf16>, vector<128x128xbf16>, vector<20x128xf32> -> vector<20x128xf32>
    %c0_34 = arith.constant 0 : index
    %c0_35 = arith.constant 0 : index
    %36 = vector.load %arg9[%c0_34, %c0_35] : memref<20x128xf32, #tpu.memory_space<vmem>>, vector<20x128xf32>
    %37 = arith.addf %36, %35 : vector<20x128xf32>
    %c0_36 = arith.constant 0 : index
    %c0_37 = arith.constant 0 : index
    %38 = vector.load %arg9[%c0_36, %c0_37] : memref<20x128xf32, #tpu.memory_space<vmem>>, vector<20x128xf32>
    tpu.vector_store %arg9[%c0_36, %c0_37], %37 {strides = array<i32>} : memref<20x128xf32, #tpu.memory_space<vmem>>, vector<20x128xf32>,
    %c64 = arith.constant 64 : index
    %c0_38 = arith.constant 0 : index
    %39 = vector.load %arg8[%c64, %c0_38] : memref<128x128xbf16, #tpu.memory_space<vmem>>, vector<20x128xbf16>
    %c3 = arith.constant 3 : index
    %c0_39 = arith.constant 0 : index
    %c0_40 = arith.constant 0 : index
    %40 = vector.load %arg5[%c3, %c0_39, %c0_40] : memref<9x128x128xbf16, #tpu.memory_space<vmem>>, vector<1x128x128xbf16>
    %41 = vector.shape_cast %40 : vector<1x128x128xbf16> to vector<128x128xbf16>
    %cst_41 = arith.constant dense<0.000000e+00> : vector<20x128xf32>
    %42 = tpu.matmul %39, %41, %cst_41 {dimension_numbers = #tpu.dot_dimension_numbers<[1], [0], [0], [1], [0, 0, 1, 1], [], []>} : vector<20x128xbf16>, vector<128x128xbf16>, vector<20x128xf32> -> vector<20x128xf32>
    %c0_42 = arith.constant 0 : index
    %c0_43 = arith.constant 0 : index
    %43 = vector.load %arg9[%c0_42, %c0_43] : memref<20x128xf32, #tpu.memory_space<vmem>>, vector<20x128xf32>
    %44 = arith.addf %43, %42 : vector<20x128xf32>
    %c0_44 = arith.constant 0 : index
    %c0_45 = arith.constant 0 : index
    %45 = vector.load %arg9[%c0_44, %c0_45] : memref<20x128xf32, #tpu.memory_space<vmem>>, vector<20x128xf32>
    tpu.vector_store %arg9[%c0_44, %c0_45], %44 {strides = array<i32>} : memref<20x128xf32, #tpu.memory_space<vmem>>, vector<20x128xf32>,
    %c96 = arith.constant 96 : index
    %c0_46 = arith.constant 0 : index
    %46 = vector.load %arg8[%c96, %c0_46] : memref<128x128xbf16, #tpu.memory_space<vmem>>, vector<20x128xbf16>
    %c4 = arith.constant 4 : index
    %c0_47 = arith.constant 0 : index
    %c0_48 = arith.constant 0 : index
    %47 = vector.load %arg5[%c4, %c0_47, %c0_48] : memref<9x128x128xbf16, #tpu.memory_space<vmem>>, vector<1x128x128xbf16>
    %48 = vector.shape_cast %47 : vector<1x128x128xbf16> to vector<128x128xbf16>
    %cst_49 = arith.constant dense<0.000000e+00> : vector<20x128xf32>
    %49 = tpu.matmul %46, %48, %cst_49 {dimension_numbers = #tpu.dot_dimension_numbers<[1], [0], [0], [1], [0, 0, 1, 1], [], []>} : vector<20x128xbf16>, vector<128x128xbf16>, vector<20x128xf32> -> vector<20x128xf32>
    %c0_50 = arith.constant 0 : index
    %c0_51 = arith.constant 0 : index
    %50 = vector.load %arg9[%c0_50, %c0_51] : memref<20x128xf32, #tpu.memory_space<vmem>>, vector<20x128xf32>
    %51 = arith.addf %50, %49 : vector<20x128xf32>
    %c0_52 = arith.constant 0 : index
    %c0_53 = arith.constant 0 : index
    %52 = vector.load %arg9[%c0_52, %c0_53] : memref<20x128xf32, #tpu.memory_space<vmem>>, vector<20x128xf32>
    tpu.vector_store %arg9[%c0_52, %c0_53], %51 {strides = array<i32>} : memref<20x128xf32, #tpu.memory_space<vmem>>, vector<20x128xf32>,
    %c65 = arith.constant 65 : index
    %c0_54 = arith.constant 0 : index
    %53 = vector.load %arg8[%c65, %c0_54] : memref<128x128xbf16, #tpu.memory_space<vmem>>, vector<20x128xbf16>
    %c5 = arith.constant 5 : index
    %c0_55 = arith.constant 0 : index
    %c0_56 = arith.constant 0 : index
    %54 = vector.load %arg5[%c5, %c0_55, %c0_56] : memref<9x128x128xbf16, #tpu.memory_space<vmem>>, vector<1x128x128xbf16>
    %55 = vector.shape_cast %54 : vector<1x128x128xbf16> to vector<128x128xbf16>
    %cst_57 = arith.constant dense<0.000000e+00> : vector<20x128xf32>
    %56 = tpu.matmul %53, %55, %cst_57 {dimension_numbers = #tpu.dot_dimension_numbers<[1], [0], [0], [1], [0, 0, 1, 1], [], []>} : vector<20x128xbf16>, vector<128x128xbf16>, vector<20x128xf32> -> vector<20x128xf32>
    %c0_58 = arith.constant 0 : index
    %c0_59 = arith.constant 0 : index
    %57 = vector.load %arg9[%c0_58, %c0_59] : memref<20x128xf32, #tpu.memory_space<vmem>>, vector<20x128xf32>
    %58 = arith.addf %57, %56 : vector<20x128xf32>
    %c0_60 = arith.constant 0 : index
    %c0_61 = arith.constant 0 : index
    %59 = vector.load %arg9[%c0_60, %c0_61] : memref<20x128xf32, #tpu.memory_space<vmem>>, vector<20x128xf32>
    tpu.vector_store %arg9[%c0_60, %c0_61], %58 {strides = array<i32>} : memref<20x128xf32, #tpu.memory_space<vmem>>, vector<20x128xf32>,
    %c5_62 = arith.constant 5 : index
    %c0_63 = arith.constant 0 : index
    %60 = vector.load %arg8[%c5_62, %c0_63] : memref<128x128xbf16, #tpu.memory_space<vmem>>, vector<20x128xbf16>
    %c6 = arith.constant 6 : index
    %c0_64 = arith.constant 0 : index
    %c0_65 = arith.constant 0 : index
    %61 = vector.load %arg5[%c6, %c0_64, %c0_65] : memref<9x128x128xbf16, #tpu.memory_space<vmem>>, vector<1x128x128xbf16>
    %62 = vector.shape_cast %61 : vector<1x128x128xbf16> to vector<128x128xbf16>
    %cst_66 = arith.constant dense<0.000000e+00> : vector<20x128xf32>
    %63 = tpu.matmul %60, %62, %cst_66 {dimension_numbers = #tpu.dot_dimension_numbers<[1], [0], [0], [1], [0, 0, 1, 1], [], []>} : vector<20x128xbf16>, vector<128x128xbf16>, vector<20x128xf32> -> vector<20x128xf32>
    %c0_67 = arith.constant 0 : index
    %c0_68 = arith.constant 0 : index
    %64 = vector.load %arg9[%c0_67, %c0_68] : memref<20x128xf32, #tpu.memory_space<vmem>>, vector<20x128xf32>
    %65 = arith.addf %64, %63 : vector<20x128xf32>
    %c0_69 = arith.constant 0 : index
    %c0_70 = arith.constant 0 : index
    %66 = vector.load %arg9[%c0_69, %c0_70] : memref<20x128xf32, #tpu.memory_space<vmem>>, vector<20x128xf32>
    tpu.vector_store %arg9[%c0_69, %c0_70], %65 {strides = array<i32>} : memref<20x128xf32, #tpu.memory_space<vmem>>, vector<20x128xf32>,
    %c37 = arith.constant 37 : index
    %c0_71 = arith.constant 0 : index
    %67 = vector.load %arg8[%c37, %c0_71] : memref<128x128xbf16, #tpu.memory_space<vmem>>, vector<20x128xbf16>
    %c7 = arith.constant 7 : index
    %c0_72 = arith.constant 0 : index
    %c0_73 = arith.constant 0 : index
    %68 = vector.load %arg5[%c7, %c0_72, %c0_73] : memref<9x128x128xbf16, #tpu.memory_space<vmem>>, vector<1x128x128xbf16>
    %69 = vector.shape_cast %68 : vector<1x128x128xbf16> to vector<128x128xbf16>
    %cst_74 = arith.constant dense<0.000000e+00> : vector<20x128xf32>
    %70 = tpu.matmul %67, %69, %cst_74 {dimension_numbers = #tpu.dot_dimension_numbers<[1], [0], [0], [1], [0, 0, 1, 1], [], []>} : vector<20x128xbf16>, vector<128x128xbf16>, vector<20x128xf32> -> vector<20x128xf32>
    %c0_75 = arith.constant 0 : index
    %c0_76 = arith.constant 0 : index
    %71 = vector.load %arg9[%c0_75, %c0_76] : memref<20x128xf32, #tpu.memory_space<vmem>>, vector<20x128xf32>
    %72 = arith.addf %71, %70 : vector<20x128xf32>
    %c0_77 = arith.constant 0 : index
    %c0_78 = arith.constant 0 : index
    %73 = vector.load %arg9[%c0_77, %c0_78] : memref<20x128xf32, #tpu.memory_space<vmem>>, vector<20x128xf32>
    tpu.vector_store %arg9[%c0_77, %c0_78], %72 {strides = array<i32>} : memref<20x128xf32, #tpu.memory_space<vmem>>, vector<20x128xf32>,
    %c6_79 = arith.constant 6 : index
    %c0_80 = arith.constant 0 : index
    %74 = vector.load %arg8[%c6_79, %c0_80] : memref<128x128xbf16, #tpu.memory_space<vmem>>, vector<20x128xbf16>
    %c8 = arith.constant 8 : index
    %c0_81 = arith.constant 0 : index
    %c0_82 = arith.constant 0 : index
    %75 = vector.load %arg5[%c8, %c0_81, %c0_82] : memref<9x128x128xbf16, #tpu.memory_space<vmem>>, vector<1x128x128xbf16>
    %76 = vector.shape_cast %75 : vector<1x128x128xbf16> to vector<128x128xbf16>
    %cst_83 = arith.constant dense<0.000000e+00> : vector<20x128xf32>
    %77 = tpu.matmul %74, %76, %cst_83 {dimension_numbers = #tpu.dot_dimension_numbers<[1], [0], [0], [1], [0, 0, 1, 1], [], []>} : vector<20x128xbf16>, vector<128x128xbf16>, vector<20x128xf32> -> vector<20x128xf32>
    %c0_84 = arith.constant 0 : index
    %c0_85 = arith.constant 0 : index
    %78 = vector.load %arg9[%c0_84, %c0_85] : memref<20x128xf32, #tpu.memory_space<vmem>>, vector<20x128xf32>
    %79 = arith.addf %78, %77 : vector<20x128xf32>
    %c0_86 = arith.constant 0 : index
    %c0_87 = arith.constant 0 : index
    %80 = vector.load %arg9[%c0_86, %c0_87] : memref<20x128xf32, #tpu.memory_space<vmem>>, vector<20x128xf32>
    tpu.vector_store %arg9[%c0_86, %c0_87], %79 {strides = array<i32>} : memref<20x128xf32, #tpu.memory_space<vmem>>, vector<20x128xf32>,
    %c0_88 = arith.constant 0 : index
    %c0_89 = arith.constant 0 : index
    %81 = vector.load %arg6[%c0_88, %c0_89] : memref<1x128xf32, #tpu.memory_space<vmem>>, vector<1x128xf32>
    %c0_90 = arith.constant 0 : index
    %c0_91 = arith.constant 0 : index
    %82 = vector.load %arg9[%c0_90, %c0_91] : memref<20x128xf32, #tpu.memory_space<vmem>>, vector<4x128xf32>
    %83 = vector.broadcast %81 : vector<1x128xf32> to vector<4x128xf32>
    %84 = arith.addf %82, %83 : vector<4x128xf32>
    %cst_92 = arith.constant 5.000000e-01 : f32
    %85 = vector.broadcast %cst_92 : f32 to vector<4x128xf32>
    %86 = arith.mulf %85, %84 : vector<4x128xf32>
    %cst_93 = arith.constant 0.707106769 : f32
    %87 = vector.broadcast %cst_93 : f32 to vector<4x128xf32>
    %88 = arith.mulf %84, %87 : vector<4x128xf32>
    %89 = math.erf %88 : vector<4x128xf32>
    %cst_94 = arith.constant 1.000000e+00 : f32
    %90 = vector.broadcast %cst_94 : f32 to vector<4x128xf32>
    %91 = arith.addf %90, %89 : vector<4x128xf32>
    %92 = arith.mulf %86, %91 : vector<4x128xf32>
    %93 = arith.truncf %92 : vector<4x128xf32> to vector<4x128xbf16>
    %c0_95 = arith.constant 0 : index
    %c0_96 = arith.constant 0 : index
    %c0_97 = arith.constant 0 : index
    %94 = vector.load %arg7[%c0_95, %c0_96, %c0_97] : memref<1x16x128xbf16, #tpu.memory_space<vmem>>, vector<1x4x128xbf16>
    %95 = vector.shape_cast %94 : vector<1x4x128xbf16> to vector<4x128xbf16>
    %96 = vector.shape_cast %93 : vector<4x128xbf16> to vector<1x4x128xbf16>
    tpu.vector_store %arg7[%c0_95, %c0_96, %c0_97], %96 {strides = array<i32>} : memref<1x16x128xbf16, #tpu.memory_space<vmem>>, vector<1x4x128xbf16>,
    %c5_98 = arith.constant 5 : index
    %c0_99 = arith.constant 0 : index
    %97 = vector.load %arg9[%c5_98, %c0_99] : memref<20x128xf32, #tpu.memory_space<vmem>>, vector<4x128xf32>
    %98 = vector.broadcast %81 : vector<1x128xf32> to vector<4x128xf32>
    %99 = arith.addf %97, %98 : vector<4x128xf32>
    %cst_100 = arith.constant 5.000000e-01 : f32
    %100 = vector.broadcast %cst_100 : f32 to vector<4x128xf32>
    %101 = arith.mulf %100, %99 : vector<4x128xf32>
    %cst_101 = arith.constant 0.707106769 : f32
    %102 = vector.broadcast %cst_101 : f32 to vector<4x128xf32>
    %103 = arith.mulf %99, %102 : vector<4x128xf32>
    %104 = math.erf %103 : vector<4x128xf32>
    %cst_102 = arith.constant 1.000000e+00 : f32
    %105 = vector.broadcast %cst_102 : f32 to vector<4x128xf32>
    %106 = arith.addf %105, %104 : vector<4x128xf32>
    %107 = arith.mulf %101, %106 : vector<4x128xf32>
    %108 = arith.truncf %107 : vector<4x128xf32> to vector<4x128xbf16>
    %c0_103 = arith.constant 0 : index
    %c4_104 = arith.constant 4 : index
    %c0_105 = arith.constant 0 : index
    %109 = vector.load %arg7[%c0_103, %c4_104, %c0_105] : memref<1x16x128xbf16, #tpu.memory_space<vmem>>, vector<1x4x128xbf16>
    %110 = vector.shape_cast %109 : vector<1x4x128xbf16> to vector<4x128xbf16>
    %111 = vector.shape_cast %108 : vector<4x128xbf16> to vector<1x4x128xbf16>
    tpu.vector_store %arg7[%c0_103, %c4_104, %c0_105], %111 {strides = array<i32>} : memref<1x16x128xbf16, #tpu.memory_space<vmem>>, vector<1x4x128xbf16>,
    %c10 = arith.constant 10 : index
    %c0_106 = arith.constant 0 : index
    %112 = vector.load %arg9[%c10, %c0_106] : memref<20x128xf32, #tpu.memory_space<vmem>>, vector<4x128xf32>
    %113 = vector.broadcast %81 : vector<1x128xf32> to vector<4x128xf32>
    %114 = arith.addf %112, %113 : vector<4x128xf32>
    %cst_107 = arith.constant 5.000000e-01 : f32
    %115 = vector.broadcast %cst_107 : f32 to vector<4x128xf32>
    %116 = arith.mulf %115, %114 : vector<4x128xf32>
    %cst_108 = arith.constant 0.707106769 : f32
    %117 = vector.broadcast %cst_108 : f32 to vector<4x128xf32>
    %118 = arith.mulf %114, %117 : vector<4x128xf32>
    %119 = math.erf %118 : vector<4x128xf32>
    %cst_109 = arith.constant 1.000000e+00 : f32
    %120 = vector.broadcast %cst_109 : f32 to vector<4x128xf32>
    %121 = arith.addf %120, %119 : vector<4x128xf32>
    %122 = arith.mulf %116, %121 : vector<4x128xf32>
    %123 = arith.truncf %122 : vector<4x128xf32> to vector<4x128xbf16>
    %c0_110 = arith.constant 0 : index
    %c8_111 = arith.constant 8 : index
    %c0_112 = arith.constant 0 : index
    %124 = vector.load %arg7[%c0_110, %c8_111, %c0_112] : memref<1x16x128xbf16, #tpu.memory_space<vmem>>, vector<1x4x128xbf16>
    %125 = vector.shape_cast %124 : vector<1x4x128xbf16> to vector<4x128xbf16>
    %126 = vector.shape_cast %123 : vector<4x128xbf16> to vector<1x4x128xbf16>
    tpu.vector_store %arg7[%c0_110, %c8_111, %c0_112], %126 {strides = array<i32>} : memref<1x16x128xbf16, #tpu.memory_space<vmem>>, vector<1x4x128xbf16>,
    %c15 = arith.constant 15 : index
    %c0_113 = arith.constant 0 : index
    %127 = vector.load %arg9[%c15, %c0_113] : memref<20x128xf32, #tpu.memory_space<vmem>>, vector<4x128xf32>
    %128 = vector.broadcast %81 : vector<1x128xf32> to vector<4x128xf32>
    %129 = arith.addf %127, %128 : vector<4x128xf32>
    %cst_114 = arith.constant 5.000000e-01 : f32
    %130 = vector.broadcast %cst_114 : f32 to vector<4x128xf32>
    %131 = arith.mulf %130, %129 : vector<4x128xf32>
    %cst_115 = arith.constant 0.707106769 : f32
    %132 = vector.broadcast %cst_115 : f32 to vector<4x128xf32>
    %133 = arith.mulf %129, %132 : vector<4x128xf32>
    %134 = math.erf %133 : vector<4x128xf32>
    %cst_116 = arith.constant 1.000000e+00 : f32
    %135 = vector.broadcast %cst_116 : f32 to vector<4x128xf32>
    %136 = arith.addf %135, %134 : vector<4x128xf32>
    %137 = arith.mulf %131, %136 : vector<4x128xf32>
    %138 = arith.truncf %137 : vector<4x128xf32> to vector<4x128xbf16>
    %c0_117 = arith.constant 0 : index
    %c12 = arith.constant 12 : index
    %c0_118 = arith.constant 0 : index
    %139 = vector.load %arg7[%c0_117, %c12, %c0_118] : memref<1x16x128xbf16, #tpu.memory_space<vmem>>, vector<1x4x128xbf16>
    %140 = vector.shape_cast %139 : vector<1x4x128xbf16> to vector<4x128xbf16>
    %141 = vector.shape_cast %138 : vector<4x128xbf16> to vector<1x4x128xbf16>
    tpu.vector_store %arg7[%c0_117, %c12, %c0_118], %141 {strides = array<i32>} : memref<1x16x128xbf16, #tpu.memory_space<vmem>>, vector<1x4x128xbf16>,
    return
  }
  func.func @transform_0(%arg0: i32) -> (i32, i32, i32) {
    %c0_i32 = arith.constant 0 : i32
    %c0_i32_0 = arith.constant 0 : i32
    %c0_i32_1 = arith.constant 0 : i32
    return %arg0, %c0_i32, %c0_i32_0 : i32, i32, i32
  }
  func.func @transform_1(%arg0: i32) -> (i32, i32) {
    %c0_i32 = arith.constant 0 : i32
    %c0_i32_0 = arith.constant 0 : i32
    %c0_i32_1 = arith.constant 0 : i32
    return %c0_i32, %c0_i32_0 : i32, i32
  }
  func.func @transform_2(%arg0: i32) -> (i32, i32) {
    %c0_i32 = arith.constant 0 : i32
    %c0_i32_0 = arith.constant 0 : i32
    %c0_i32_1 = arith.constant 0 : i32
    return %c0_i32, %c0_i32_0 : i32, i32
  }
  func.func @transform_3(%arg0: i32) -> (i32, i32) {
    %c0_i32 = arith.constant 0 : i32
    %c0_i32_0 = arith.constant 0 : i32
    %c0_i32_1 = arith.constant 0 : i32
    return %c0_i32, %c0_i32_0 : i32, i32
  }
  func.func @transform_4(%arg0: i32) -> (i32, i32, i32) {
    %c0_i32 = arith.constant 0 : i32
    %c0_i32_0 = arith.constant 0 : i32
    %c0_i32_1 = arith.constant 0 : i32
    %c0_i32_2 = arith.constant 0 : i32
    return %c0_i32, %c0_i32_0, %c0_i32_1 : i32, i32, i32
  }
  func.func @transform_5(%arg0: i32) -> (i32, i32) {
    %c0_i32 = arith.constant 0 : i32
    %c0_i32_0 = arith.constant 0 : i32
    %c0_i32_1 = arith.constant 0 : i32
    return %c0_i32, %c0_i32_0 : i32, i32
  }
  func.func @transform_6(%arg0: i32) -> (i32, i32, i32) {
    %c0_i32 = arith.constant 0 : i32
    %c0_i32_0 = arith.constant 0 : i32
    %c0_i32_1 = arith.constant 0 : i32
    return %arg0, %c0_i32, %c0_i32_0 : i32, i32, i32
  }
}

</mosaic_0001>

<bundles_post_ra>
// kernel: patch_embed_forward.1
= control target key start
LH: loop header
LB: loop body
LE: loop exit
PB: predicated region body
PF: predicated region fallthrough
CT: control target
= control target key end

     0   :  { %11 = vsyncpa [#allocation5], 0  ;;  %s4551_s0 = inlined_call_operand.vmem [shape: bf16[2,128,72], index: 0, kind: input, shape index: {}]   ;;  %s4552_s1 = inlined_call_operand.vmem [shape: f32[128,1], index: 1, kind: input, shape index: {}]   ;;  %s4553_s2 = inlined_call_operand.vmem [shape: bf16[72,128], index: 2, kind: input, shape index: {}]   ;;  %s4554_s3 = inlined_call_operand.vmem [shape: f32[1,128], index: 3, kind: input, shape index: {}]   ;;  %s4555_s4 = inlined_call_operand.vmem [shape: bf16[9,128,128], index: 4, kind: input, shape index: {}]   ;;  %s4556_s5 = inlined_call_operand.vmem [shape: f32[1,128], index: 5, kind: input, shape index: {}]   ;;  %s4557_s6 = inlined_call_operand.hbm [shape: bf16[2,16,128], index: 6, kind: output, shape index: {}]  }
   0x1   :  { %13 = vsyncpa [#allocation5 + $0x1], 0  ;;  %s3457_s21 = smov 0   ;;  %s3459_s22 = smov 0  }
   0x2   :  { %s3461_s23 = smov 0   ;;  %s3463_s24 = smov 0  }
   0x3 LB: > { %s3478_s25 = sadd.s32 4294967295, %s3417_s24   ;;  %s2570_s26 = sadd.s32 4294967294, %s3417_s24   ;;  %s3417_s24 = sphi %s3463_s24, %s4577_s24   ;;  %s3413_s23 = sphi %s3461_s23, %s4576_s23   ;;  %s3409_s22 = sphi %s3459_s22, %s4575_s22   ;;  %s3405_s21 = sphi %s3457_s21, %s4574_s21  }
   0x4   : > { %s3482_s27 = sadd.s32 1, %s3417_s24   ;;  %s157_s28 = sadd.s32 1, %s3413_s23 }
   0x5   : > { %s154_s29 = ssub.s32 %s3417_s24, %s3482_s27  ;;  %p167_p0 = scmp.ne.s32.totalorder %s3413_s23, %s3409_s22 }
   0x6   : > { %p155_p1 = scmp.eq.s32.totalorder %s154_s29, 0  ;;  %p168_p2 = scmp.eq.s32.totalorder %s3478_s25, 1 }
   0x7   : > { %p173_p3 = scmp.ne.s32.totalorder %s3409_s22, %s3405_s21  ;;  %p174_p4 = scmp.eq.s32.totalorder %s2570_s26, 1 }
   0x8   : > { %s3493_s30 = scalar_select %p155_p1, %s3413_s23, %s157_s28  }
   0x9   : > { %p3495_p5 = por %p168_p2, %p167_p0  ;;  %p3499_p6 = por %p174_p4, %p173_p3 }
   0xa   : > { %p2573_p7 = scmp.ge.s32.totalorder %s3417_s24, 1  ;;  %p215_p8 = scmp.lt.s32.totalorder %s3417_s24, 3 }
   0xc   : > { %p216_p9 = pnand %p2573_p7, %p215_p8 }
   0xd   : > { %p245_p10 = scmp.lt.s32.totalorder (!%p216_p9), %s3478_s25, 1  ;;  %s242_s13 = sand.u32 (!%p216_p9), 1, %s3409_s22  }
   0xe   : > { %219 = sbr.rel (%p216_p9) target bundleno = 657 (0x291), region = 44  ;;  %s2493_s26 = scalar_lea.sflag (!%p216_p9), [#allocation5], %s242_s13 }
   0xf   : > { %s3375_s11 = scalar_lea.hbm (!%p216_p9), %s4557_s6, 16 }
  0x13   : > { %v275_v0 = vld [vmem:[%s4553_s2 + $0x20] sm:$0xf]  ;;  %vm372_vm0 = vcmask 1043456   ;;  %v3134_v4 = vld [vmem:[%s4553_s2 + $0x18] sm:$0xff]  ;;  %v3133_v5 = vld [vmem:[%s4553_s2 + $0x10] sm:$0xff]  ;;  %s246_s15 = scalar_select %p245_p10, %s3478_s25, 1 }
  0x14   : > { %v337_v1 = vunpack.c.l.b16 %v275_v0  ;;  %v3132_v6 = vld [vmem:[%s4553_s2 + $0x8] sm:$0xff]  ;;  %v3131_v7 = vld [vmem:[%s4553_s2] sm:$0xff]  ;;  %vm347_vm1 = vcmask 588800   ;;  %v3419_v11 = vmov 0   ;;  %v1135_v17 = vld [vmem:[%s4552_s1 + $0x30] sm:$0xff] }
  0x15   : > { %s3122_s18 = sshll.u32 %s246_s15, 6  ;;  %v1129_v10 = vld [vmem:[%s4552_s1] sm:$0xff]  ;;  %3309 = vset.pattern.permute.xlu0 %v3419_v11  ;;  %3310 = vset.pattern.permute.xlu1 %v3419_v11  ;;  %v1130_v13 = vld [vmem:[%s4552_s1 + $0x8] sm:$0xff]  ;;  %v1131_v19 = vld [vmem:[%s4552_s1 + $0x10] sm:$0xff]  ;;  %s3219_s15 = sshll.u32 %s3478_s25, 3 }
  0x16   : > { %v342_v2 = vpack.c.b16 %v337_v1, %v337_v1  ;;  %s3525_s29 = scalar_lea.vmem %s4551_s0, %s3122_s18  ;;  %1147 = vperm.xlu0 %3309, %v1129_v10   ;;  %3311 = vset.pattern.permute.xlu2 %v3419_v11  ;;  %v1133_v15 = vld [vmem:[%s4552_s1 + $0x20] sm:$0xff]  ;;  %v1134_v18 = vld [vmem:[%s4552_s1 + $0x28] sm:$0xff]  ;;  %v1132_v21 = vld [vmem:[%s4552_s1 + $0x18] sm:$0xff]  ;;  %s2504_s18 = scalar_lea.hbm %s4557_s6, %s3219_s15 }
  0x17   : > { %v3123_v8 = vld [vmem:[%s3525_s29] sm:$0xff]  ;;  %v3124_v9 = vld [vmem:[%s3525_s29 + $0x8] sm:$0xff]  ;;  %v3125_v12 = vld [vmem:[%s3525_s29 + $0x10] sm:$0xff]  ;;  %1167 = vperm.xlu1 %3310, %v1133_v15   ;;  %1157 = vperm.xlu2 %3311, %v1131_v19   ;;  %s2507_s20 = sshll.u32 %s2504_s18, 4  ;;  %s2508_s20 = int_to_ptr.hbm [resolvable:$true] %s2507_s20 }
  0x18   : > { %v374_v3 = vsel %vm372_vm0, %v342_v2, 0  ;;  %v3126_v14 = vld [vmem:[%s3525_s29 + $0x18] sm:$0xff]  ;;  %v3127_v16 = vld [vmem:[%s3525_s29 + $0x20] sm:$0xff]  ;;  %v1138_v20 = vld [vmem:[%s4552_s1 + $0x48] sm:$0xff]  ;;  %s3369_s25 = sshra.s32 %s2508_s20, 4  ;;  %s3370_s25 = int_to_ptr.hbm [resolvable:$true] %s3369_s25 }
  0x19   : > { %379 = vmatpush.bf16.msra.mxu0 %v374_v3  ;;  %v3128_v22 = vld [vmem:[%s3525_s29 + $0x28] sm:$0xff]  ;;  %v1136_v23 = vld [vmem:[%s4552_s1 + $0x38] sm:$0xff]  ;;  %v1139_v24 = vld [vmem:[%s4552_s1 + $0x50] sm:$0xff]  ;;  %s3371_s28 = scalar_lea.hbm %s3370_s25, 8  ;;  %p3376_p0 = scmp.lt.s32.totalorder %s3370_s25, %s4557_s6 }
  0x1a   : > { %v1141_v25 = vld [vmem:[%s4552_s1 + $0x60] sm:$0xff]  ;;  %v3129_v26 = vld [vmem:[%s3525_s29 + $0x30] sm:$0xff]  ;;  %v1144_v27 = vld [vmem:[%s4552_s1 + $0x78] sm:$0xff]  ;;  %p3372_p11 = scmp.ne.s32.totalorder %s3370_s25, %s3371_s28  ;;  %p3377_p1 = scmp.lt.s32.totalorder %s3375_s11, %s3371_s28 }
  0x1b   : > { %v1140_v28 = vld [vmem:[%s4552_s1 + $0x58] sm:$0xff]  ;;  %v1137_v30 = vld [vmem:[%s4552_s1 + $0x40] sm:$0xff]  ;;  %v1142_v31 = vld [vmem:[%s4552_s1 + $0x68] sm:$0xff] }
  0x1c   : > { %v3130_v29 = vld [vmem:[%s3525_s29 + $0x38] sm:$0xff]  ;;  %v3591_v32 = vld [vmem:[%s4554_s3] ss:$0 sm:$0xff]  ;;  %v1143_v34 = vld [vmem:[%s4552_s1 + $0x70] sm:$0xff]  ;;  %s2574_s29 = sshll.u32 %s242_s13, 3  ;;  %p3373_p12 = pnand %p3372_p11, %p3495_p5 }
  0x1d   : > { %380 = vmatpush.bf16.msra.mxu0 %v3134_v4  ;;  %v3143_v45 = vld [vmem:[%s4555_s4 + $0x38] sm:$0xff]  ;;  %v3142_v51 = vld [vmem:[%s4555_s4 + $0x30] sm:$0xff]  ;;  %v3141_v60 = vld [vmem:[%s4555_s4 + $0x28] sm:$0xff]  ;;  %s4497_s14 = scalar_lea.vmem [#allocation4], %s2574_s29  ;;  %p3378_p2 = por %p3377_p1, %p3376_p0 }
  0x1e   : > { %1152 = vperm.xlu0 %3309, %v1130_v13   ;;  %1350 = vmatpush.bf16.msra.mxu1 %v3143_v45  ;;  %s2505_s19 = sshll.u32 %s4497_s14, 4  ;;  %p3374_p13 = pneg %p3373_p12  ;;  %s2506_s19 = int_to_ptr.vmem [resolvable:$true] %s2505_s19 }
  0x1f   : > { %1172 = vperm.xlu1 %3310, %v1134_v18   ;;  %1162 = vperm.xlu2 %3311, %v1132_v21   ;;  %v3139_v21 = vld [vmem:[%s4555_s4 + $0x18] sm:$0xff] }
  0x20   : > { %p3379_p3 = pnand %p3378_p2, %p3374_p13 }
  0x21   : > { %381 = vmatpush.bf16.msra.mxu0 %v3133_v5 }
  0x22   : > { %1351 = vmatpush.bf16.msra.mxu1 %v3142_v51 }
  0x25   : > { %382 = vmatpush.bf16.msra.mxu0 %v3132_v6 }
  0x26   : > { %1177 = vperm.xlu0 %3309, %v1135_v17   ;;  %1352 = vmatpush.bf16.msra.mxu1 %v3141_v60  ;;  %v3137_v60 = vld [vmem:[%s4555_s4 + $0x8] sm:$0xff] }
  0x27   : > { %1182 = vperm.xlu1 %3310, %v1136_v23   ;;  %1187 = vperm.xlu2 %3311, %v1137_v30  }
  0x29   : > { %383 = vmatpush.bf16.msra.mxu0 %v3131_v7 }
  0x2c   : > { %2625 = vmatmul.msk.bf16.vlgmr.msra.gmra.mxu0 %vm347_vm1, %v3123_v8 }
  0x2e   : > { %1192 = vperm.xlu0 %3309, %v1138_v20  }
  0x2f   : > { %1207 = vperm.xlu1 %3310, %v1141_v25   ;;  %1212 = vperm.xlu2 %3311, %v1142_v31  }
  0x36   : > { %1197 = vperm.xlu0 %3309, %v1139_v24  }
  0x37   : > { %1202 = vperm.xlu1 %3310, %v1140_v28   ;;  %1217 = vperm.xlu2 %3311, %v1143_v34  }
  0x3c   : > { %2626 = vmatmul.msk.bf16.gmra.mxu0 %vm347_vm1, %v3124_v9  ;;  %v3140_v9 = vld [vmem:[%s4555_s4 + $0x20] sm:$0xff] }
  0x3d   : > { %1353 = vmatpush.bf16.msra.mxu1 %v3140_v9 }
  0x3e   : > { %1222 = vperm.xlu0 %3309, %v1144_v27  }
  0x41   : > { %1354 = vmatpush.bf16.msra.mxu1 %v3139_v21 }
  0x4c   : > { %2627 = vmatmul.msk.bf16.gmra.mxu0 %vm347_vm1, %v3125_v12 }
  0x5c   : > { %2628 = vmatmul.msk.bf16.gmra.mxu0 %vm347_vm1, %v3126_v14 }
  0x6c   : > { %2629 = vmatmul.msk.bf16.gmra.mxu0 %vm347_vm1, %v3127_v16 }
  0x7c   : > { %2630 = vmatmul.msk.bf16.gmra.mxu0 %vm347_vm1, %v3128_v22 }
  0x8c   : > { %2631 = vmatmul.msk.bf16.gmra.mxu0 %vm347_vm1, %v3129_v26 }
  0x9c   : > { %2632 = vmatmul.msk.bf16.gmra.mxu0 %vm347_vm1, %v3130_v29 }
  0xa9   : > { %v385_v33 = vpop.f32.mrf.mxu0 }
  0xaa   : > { %v3597_v35 = vadd.f32 %v3591_v32, %v385_v33 }
  0xac   : > { %v3600_v36 = vmul.f32 0.70710677, %v3597_v35 }
  0xae   : > { %v457_v37 = vmul.f32 %v3600_v36, %v3600_v36 }
  0xb0   : > { %v3604_v38 = vmin.f32 %v457_v37, 16.0 }
  0xb1   : > { %v387_v39 = vpop.f32.mrf.mxu0 }
  0xb2   : > { %v459_v40 = vmul.f32 2.1237322e-06, %v3604_v38  ;;  %v3608_v41 = vadd.f32 %v3591_v32, %v387_v39  ;;  %v470_v42 = vmul.f32 3.8918573e-05, %v3604_v38 }
  0xb4   : > { %v460_v43 = vadd.f32 0.00028619796, %v459_v40  ;;  %v3612_v44 = vmul.f32 0.70710677, %v3608_v41  ;;  %v471_v46 = vadd.f32 0.001143296, %v470_v42 }
  0xb6   : > { %v497_v47 = vmul.f32 %v3612_v44, %v3612_v44  ;;  %v472_v48 = vmul.f32 %v471_v46, %v3604_v38  ;;  %v461_v49 = vmul.f32 %v460_v43, %v3604_v38  ;;  %v3138_v43 = vld [vmem:[%s4555_s4 + $0x10] sm:$0xff] }
  0xb7   : > { %1355 = vmatpush.bf16.msra.mxu1 %v3138_v43 }
  0xb8   : > { %v3621_v50 = vmin.f32 %v497_v47, 16.0  ;;  %v473_v53 = vadd.f32 0.014752088, %v472_v48  ;;  %v462_v58 = vadd.f32 0.0036580483, %v461_v49 }
  0xb9   : > { %v390_v52 = vpop.f32.mrf.mxu0 }
  0xba   : > { %v499_v54 = vmul.f32 2.1237322e-06, %v3621_v50  ;;  %v3628_v55 = vadd.f32 %v3591_v32, %v390_v52  ;;  %v510_v56 = vmul.f32 3.8918573e-05, %v3621_v50  ;;  %v474_v57 = vmul.f32 %v473_v53, %v3604_v38 }
  0xbb   : > { %v463_v4 = vmul.f32 %v462_v58, %v3604_v38  ;;  %1356 = vmatpush.bf16.msra.mxu1 %v3137_v60  ;;  %v3152_v60 = vld [vmem:[%s4555_s4 + $0x78] sm:$0xff] }
  0xbc   : > { %v500_v59 = vadd.f32 0.00028619796, %v499_v54  ;;  %v3636_v61 = vmul.f32 0.70710677, %v3628_v55  ;;  %v475_v62 = vadd.f32 0.112945676, %v474_v57  ;;  %1449 = vmatpush.bf16.msra.mxu2 %v3152_v60 }
  0xbd   : > { %v511_v63 = vadd.f32 0.001143296, %v510_v56  ;;  %v464_v16 = vadd.f32 0.05243302, %v463_v4 }
  0xbe   : > { %v501_v0 = vmul.f32 %v500_v59, %v3621_v50  ;;  %v537_v1 = vmul.f32 %v3636_v61, %v3636_v61  ;;  %v476_v2 = vmul.f32 %v475_v62, %v3604_v38  ;;  %v3161_v59 = vld [vmem:[%s4555_s4 + $0xb8] sm:$0xff] }
  0xbf   : > { %v512_v3 = vmul.f32 %v511_v63, %v3621_v50  ;;  %v465_v25 = vmul.f32 %v464_v16, %v3604_v38  ;;  %1570 = vmatpush.bf16.msra.mxu3 %v3161_v59  ;;  %v3159_v59 = vld [vmem:[%s4555_s4 + $0xa8] sm:$0xff] }
  0xc0   : > { %v502_v5 = vadd.f32 0.0036580483, %v501_v0  ;;  %v3644_v6 = vmin.f32 %v537_v1, 16.0  ;;  %v477_v8 = vadd.f32 0.4994258, %v476_v2 }
  0xc1   : > { %v392_v7 = vpop.f32.mrf.mxu0  ;;  %v513_v10 = vadd.f32 0.014752088, %v512_v3  ;;  %v466_v40 = vadd.f32 0.18741608, %v465_v25 }
  0xc2   : > { %v3650_v11 = vadd.f32 %v3591_v32, %v392_v7  ;;  %v539_v12 = vmul.f32 2.1237322e-06, %v3644_v6  ;;  %v478_v13 = vmul.f32 %v477_v8, %v3604_v38  ;;  %v550_v15 = vmul.f32 3.8918573e-05, %v3644_v6 }
  0xc3   : > { %v514_v14 = vmul.f32 %v513_v10, %v3621_v50  ;;  %v503_v17 = vmul.f32 %v502_v5, %v3621_v50  ;;  %v467_v56 = vmul.f32 %v466_v40, %v3604_v38 }
  0xc4   : > { %v540_v18 = vadd.f32 0.00028619796, %v539_v12  ;;  %v3658_v19 = vmul.f32 0.70710677, %v3650_v11  ;;  %v3660_v20 = vadd.f32 1.0, %v478_v13 }
  0xc5   : > { %v515_v22 = vadd.f32 0.112945676, %v514_v14  ;;  %v551_v23 = vadd.f32 0.001143296, %v550_v15  ;;  %v504_v27 = vadd.f32 0.05243302, %v503_v17 }
  0xc6   : > { %v577_v24 = vmul.f32 %v3658_v19, %v3658_v19  ;;  %3314 = vrcp.f32 %v3660_v20  ;;  %v541_v28 = vmul.f32 %v540_v18, %v3644_v6  ;;  %v491_v1 = vand.u32 2147483648, %v3660_v20 }
  0xc7   : > { %v516_v26 = vmul.f32 %v515_v22, %v3621_v50  ;;  %v552_v31 = vmul.f32 %v551_v23, %v3644_v6  ;;  %v505_v46 = vmul.f32 %v504_v27, %v3621_v50  ;;  %v489_v4 = vand.u32 2147483647, %v3660_v20 }
  0xc8   : > { %v3671_v29 = vmin.f32 %v577_v24, 16.0  ;;  %v542_v47 = vadd.f32 0.0036580483, %v541_v28  ;;  %vm485_vm3 = vweird.f32 %v3660_v20  ;;  %v468_v12 = vadd.f32 1.1283791, %v467_v56 }
  0xc9   : > { %v395_v30 = vpop.f32.mrf.mxu0  ;;  %v517_v37 = vadd.f32 0.4994258, %v516_v26  ;;  %v553_v39 = vadd.f32 0.014752088, %v552_v31  ;;  %v506_v62 = vadd.f32 0.18741608, %v505_v46 }
  0xca   : > { %v3675_v33 = vadd.f32 %v3591_v32, %v395_v30  ;;  %v579_v34 = vmul.f32 2.1237322e-06, %v3671_v29  ;;  %v543_v63 = vmul.f32 %v542_v47, %v3644_v6  ;;  %v590_v7 = vmul.f32 3.8918573e-05, %v3671_v29 }
  0xcb   : > { %v518_v48 = vmul.f32 %v517_v37, %v3621_v50  ;;  %v554_v49 = vmul.f32 %v553_v39, %v3644_v6  ;;  %v507_v13 = vmul.f32 %v506_v62, %v3621_v50  ;;  %v492_v14 = vor.u32 1.1754944e-38, %v491_v1  ;;  %v3160_v39 = vld [vmem:[%s4555_s4 + $0xb0] sm:$0xff] }
  0xcc   : > { %v3679_v42 = vmul.f32 0.70710677, %v3675_v33  ;;  %v3315_v45 = vpop.eup %3314  ;;  %v580_v51 = vadd.f32 0.00028619796, %v579_v34  ;;  %v544_v15 = vadd.f32 0.05243302, %v543_v63  ;;  %v469_v26 = vmul.f32 %v468_v12, %v3600_v36  ;;  %1571 = vmatpush.bf16.msra.mxu3 %v3160_v39 }
  0xcd   : > { %v481_v52 = vmul.f32 %v3315_v45, %v3660_v20  ;;  %v3688_v53 = vadd.f32 1.0, %v518_v48  ;;  %v555_v54 = vadd.f32 0.112945676, %v554_v49  ;;  %vm486_vm2 = vweird.f32 %v3315_v45  ;;  %v3136_v36 = vld [vmem:[%s4555_s4] sm:$0xff] }
  0xce   : > { %v617_v57 = vmul.f32 %v3679_v42, %v3679_v42  ;;  %v581_v38 = vmul.f32 %v580_v51, %v3671_v29  ;;  %vm487_vm4 = vmor %vm485_vm3, %vm486_vm2  ;;  %vm490_vm5 = vcmp.eq.f32.partialorder %v489_v4, 8.507059e+37  ;;  %v591_v22 = vadd.f32 0.001143296, %v590_v7  ;;  %1357 = vmatpush.bf16.msra.mxu1 %v3136_v36 }
  0xcf   : > { %v482_v58 = vsub.f32 1.0, %v481_v52  ;;  %3316 = vrcp.f32 %v3688_v53  ;;  %v556_v5 = vmul.f32 %v555_v54, %v3644_v6  ;;  %v508_v30 = vadd.f32 1.1283791, %v507_v13 }
  0xd0   : > { %v3709_v8 = vmin.f32 %v617_v57, 16.0  ;;  %v582_v16 = vadd.f32 0.0036580483, %v581_v38  ;;  %v592_v28 = vmul.f32 %v591_v22, %v3671_v29  ;;  %v545_v31 = vmul.f32 %v544_v15, %v3644_v6  ;;  %1572 = vmatpush.bf16.msra.mxu3 %v3159_v59 }
  0xd1   : > { %v397_v0 = vpop.f32.mrf.mxu0  ;;  %v483_v3 = vmul.f32 %v3315_v45, %v482_v58  ;;  %v557_v18 = vadd.f32 0.4994258, %v556_v5  ;;  %v531_v49 = vand.u32 2147483648, %v3688_v53  ;;  %v1148_v58 = vpop.permute.xlu0 %1147  ;;  %vm525_vm7 = vweird.f32 %v3688_v53 }
  0xd2   : > { %v3704_v2 = vadd.f32 %v3591_v32, %v397_v0  ;;  %v619_v23 = vmul.f32 2.1237322e-06, %v3709_v8  ;;  %v583_v34 = vmul.f32 %v582_v16, %v3671_v29  ;;  %v593_v54 = vadd.f32 0.014752088, %v592_v28 }
  0xd3   : > { %v484_v10 = vadd.f32 %v3315_v45, %v483_v3  ;;  %v558_v27 = vmul.f32 %v557_v18, %v3644_v6  ;;  %v546_v56 = vadd.f32 0.18741608, %v545_v31  ;;  %v509_v1 = vmul.f32 %v508_v30, %v3612_v44 }
  0xd4   : > { %v3712_v9 = vmul.f32 0.70710677, %v3704_v2  ;;  %v620_v47 = vadd.f32 0.00028619796, %v619_v23  ;;  %v584_v57 = vadd.f32 0.05243302, %v583_v34  ;;  %v594_v12 = vmul.f32 %v593_v54, %v3671_v29 }
  0xd5   : > { %v488_v17 = vsel %vm487_vm4, %v3315_v45, %v484_v10  ;;  %v3317_v21 = vpop.eup %3316  ;;  %v529_v45 = vand.u32 2147483647, %v3688_v53  ;;  %v3735_v46 = vadd.f32 1.0, %v558_v27  ;;  %v532_v3 = vor.u32 1.1754944e-38, %v531_v49 }
  0xd6   : > { %v657_v24 = vmul.f32 %v3712_v9, %v3712_v9  ;;  %v493_v25 = vsel %vm490_vm5, %v492_v14, %v488_v17  ;;  %v521_v20 = vmul.f32 %v3317_v21, %v3688_v53  ;;  %vm526_vm6 = vweird.f32 %v3317_v21 }
  0xd7   : > { %v494_v40 = vmul.f32 %v493_v25, %v469_v26  ;;  %3318 = vrcp.f32 %v3735_v46  ;;  %v621_v38 = vmul.f32 %v620_v47, %v3709_v8  ;;  %vm527_vm8 = vmor %vm525_vm7, %vm526_vm6  ;;  %vm530_vm9 = vcmp.eq.f32.partialorder %v529_v45, 8.507059e+37 }
  0xd8   : > { %v522_v43 = vsub.f32 1.0, %v521_v20  ;;  %v3737_v48 = vmin.f32 %v657_v24, 16.0  ;;  %v547_v53 = vmul.f32 %v546_v56, %v3644_v6  ;;  %v585_v44 = vmul.f32 %v584_v57, %v3671_v29 }
  0xd9   : > { %v400_v50 = vpop.f32.mrf.mxu0  ;;  %v2633_v63 = vclamps-f32 %v494_v40, 1.0  ;;  %v595_v18 = vadd.f32 0.112945676, %v594_v12  ;;  %v425_v22 = vmul.f32 0.5, %v3597_v35  ;;  %v622_v23 = vadd.f32 0.0036580483, %v621_v38  ;;  %v1153_v40 = vpop.permute.xlu0 %1152 }
  0xda   : > { %v3726_v37 = vadd.f32 %v3591_v32, %v400_v50  ;;  %v523_v52 = vmul.f32 %v3317_v21, %v522_v43  ;;  %v659_v4 = vmul.f32 2.1237322e-06, %v3737_v48  ;;  %v426_v6 = vmul.f32 0.5, %v3608_v41 }
  0xdb   : > { %v1097_v16 = vadd.f32 1.0, %v2633_v63  ;;  %v548_v50 = vadd.f32 1.1283791, %v547_v53  ;;  %v586_v27 = vadd.f32 0.18741608, %v585_v44  ;;  %v596_v30 = vmul.f32 %v595_v18, %v3671_v29  ;;  %v3151_v44 = vld [vmem:[%s4555_s4 + $0x70] sm:$0xff] }
  0xdc   : > { %v3741_v51 = vmul.f32 0.70710677, %v3726_v37  ;;  %v524_v0 = vadd.f32 %v3317_v21, %v523_v52  ;;  %v660_v25 = vadd.f32 0.00028619796, %v659_v4  ;;  %v630_v39 = vmul.f32 3.8918573e-05, %v3709_v8  ;;  %1450 = vmatpush.bf16.msra.mxu2 %v3151_v44 }
  0xdd   : > { %v3765_v15 = vpop.eup %3318  ;;  %v1113_v31 = vmul.f32 %v1097_v16, %v425_v22  ;;  %v623_v36 = vmul.f32 %v622_v23, %v3709_v8  ;;  %v597_v45 = vadd.f32 0.4994258, %v596_v30  ;;  %vm565_vm11 = vweird.f32 %v3735_v46 }
  0xde   : > { %v697_v62 = vmul.f32 %v3741_v51, %v3741_v51  ;;  %v528_v10 = vsel %vm527_vm8, %v3317_v21, %v524_v0  ;;  %v561_v24 = vmul.f32 %v3765_v15, %v3735_v46  ;;  %v661_v47 = vmul.f32 %v660_v25, %v3737_v48 }
  0xdf   : > { %v533_v14 = vsel %vm530_vm9, %v532_v3, %v528_v10  ;;  %v631_v56 = vadd.f32 0.001143296, %v630_v39  ;;  %vm566_vm10 = vweird.f32 %v3765_v15  ;;  %v598_v60 = vmul.f32 %v597_v45, %v3671_v29 }
  0xe0   : > { %v3757_v5 = vmin.f32 %v697_v62, 16.0  ;;  %v534_v17 = vmul.f32 %v533_v14, %v509_v1  ;;  %v562_v28 = vsub.f32 1.0, %v561_v24  ;;  %v1225_v62 = vmul.f32 %v1148_v58, %v1113_v31  ;;  %vm3802_vm12 = vmor %vm565_vm11, %vm566_vm10 }
  0xe1   : > { %v402_v7 = vpop.f32.mrf.mxu0  ;;  %v571_v0 = vand.u32 2147483648, %v3735_v46  ;;  %v632_v1 = vmul.f32 %v631_v56, %v3709_v8  ;;  %v569_v4 = vand.u32 2147483647, %v3735_v46  ;;  %v662_v10 = vadd.f32 0.0036580483, %v661_v47 }
  0xe2   : > { %v3763_v13 = vadd.f32 %v3591_v32, %v402_v7  ;;  %v699_v21 = vmul.f32 2.1237322e-06, %v3757_v5  ;;  %v2634_v26 = vclamps-f32 %v534_v17, 1.0  ;;  %v563_v43 = vmul.f32 %v3765_v15, %v562_v28  ;;  %v3158_v7 = vld [vmem:[%s4555_s4 + $0xa0] sm:$0xff] }
  0xe3   : > { %v624_v14 = vadd.f32 0.05243302, %v623_v36  ;;  %v3814_v17 = vadd.f32 1.0, %v598_v60  ;;  %1573 = vmatpush.bf16.msra.mxu3 %v3158_v7  ;;  %v587_v18 = vmul.f32 %v586_v27, %v3671_v29  ;;  %v572_v22 = vor.u32 1.1754944e-38, %v571_v0  ;;  %v3150_v29 = vld [vmem:[%s4555_s4 + $0x68] sm:$0xff] }
  0xe4   : > { %v3773_v20 = vmul.f32 0.70710677, %v3763_v13  ;;  %v1098_v34 = vadd.f32 1.0, %v2634_v26  ;;  %v700_v41 = vadd.f32 0.00028619796, %v699_v21  ;;  %v564_v59 = vadd.f32 %v3765_v15, %v563_v43  ;;  %1451 = vmatpush.bf16.msra.mxu2 %v3150_v29  ;;  %v1158_v29 = vpop.permute.xlu2 %1157 }
  0xe5   : > { %v633_v23 = vadd.f32 0.014752088, %v632_v1  ;;  %v710_v21 = vmul.f32 3.8918573e-05, %v3757_v5  ;;  %vm570_vm13 = vcmp.eq.f32.partialorder %v569_v4, 8.507059e+37  ;;  %3320 = vrcp.f32 %v3814_v17 }
  0xe6   : > { %v737_v35 = vmul.f32 %v3773_v20, %v3773_v20  ;;  %v1114_v52 = vmul.f32 %v1098_v34, %v426_v6  ;;  %v701_v38 = vmul.f32 %v700_v41, %v3757_v5  ;;  %v568_v16 = vsel %vm3802_vm12, %v3765_v15, %v564_v59  ;;  %v3157_v15 = vld [vmem:[%s4555_s4 + $0x98] sm:$0xff] }
  0xe7   : > { %v663_v25 = vmul.f32 %v662_v10, %v3737_v48  ;;  %v573_v27 = vsel %vm570_vm13, %v572_v22, %v568_v16  ;;  %v634_v30 = vmul.f32 %v633_v23, %v3709_v8  ;;  %v549_v31 = vmul.f32 %v548_v50, %v3636_v61  ;;  %1574 = vmatpush.bf16.msra.mxu3 %v3157_v15 }
  0xe8   : > { %v3782_v49 = vmin.f32 %v737_v35, 16.0  ;;  %v1226_v63 = vmul.f32 %v1153_v40, %v1114_v52  ;;  %v702_v24 = vadd.f32 0.0036580483, %v701_v38  ;;  %v588_v39 = vadd.f32 1.1283791, %v587_v18 }
  0xe9   : > { %v405_v54 = vpop.f32.mrf.mxu0  ;;  %v625_v36 = vmul.f32 %v624_v14, %v3709_v8  ;;  %v635_v41 = vadd.f32 0.112945676, %v634_v30  ;;  %v711_v40 = vadd.f32 0.001143296, %v710_v21  ;;  %v574_v45 = vmul.f32 %v573_v27, %v549_v31 }
  0xea   : > { %v3785_v57 = vadd.f32 %v3591_v32, %v405_v54  ;;  %v739_v58 = vmul.f32 2.1237322e-06, %v3782_v49  ;;  %v3223_v12 = vpack.c.bf16 %v1226_v63, %v1225_v62  ;;  %v703_v43 = vmul.f32 %v702_v24, %v3757_v5 }
  0xeb   : > { %v664_v52 = vadd.f32 0.05243302, %v663_v25  ;;  %v636_v50 = vmul.f32 %v635_v41, %v3709_v8  ;;  %v3321_v54 = vpop.eup %3320  ;;  %v427_v56 = vmul.f32 0.5, %v3628_v55  ;;  %v589_v63 = vmul.f32 %v588_v39, %v3658_v19  ;;  %v3156_v19 = vld [vmem:[%s4555_s4 + $0x90] sm:$0xff]  ;;  %v3155_v39 = vld [vmem:[%s4555_s4 + $0x88] sm:$0xff] }
  0xec   : > { %v3794_v3 = vmul.f32 0.70710677, %v3785_v57  ;;  %3224 = vst [vmem:[#allocation2 + $0x30] sm:$0xff] %v3223_v12   ;;  %v740_v26 = vadd.f32 0.00028619796, %v739_v58  ;;  %v601_v1 = vmul.f32 %v3321_v54, %v3814_v17  ;;  %v712_v38 = vmul.f32 %v711_v40, %v3757_v5  ;;  %1575 = vmatpush.bf16.msra.mxu3 %v3156_v19 }
  0xed   : > { %v3845_v0 = vadd.f32 0.18741608, %v625_v36  ;;  %v704_v4 = vadd.f32 0.05243302, %v703_v43  ;;  %v2635_v7 = vclamps-f32 %v574_v45, 1.0  ;;  %v665_v55 = vmul.f32 %v664_v52, %v3737_v48  ;;  %v3148_v36 = vld [vmem:[%s4555_s4 + $0x58] sm:$0xff] }
  0xee   : > { %v777_v46 = vmul.f32 %v3794_v3, %v3794_v3  ;;  %v741_v61 = vmul.f32 %v740_v26, %v3782_v49  ;;  %v637_v58 = vadd.f32 0.4994258, %v636_v50  ;;  %v602_v53 = vsub.f32 1.0, %v601_v1 }
  0xef   : > { %v611_v44 = vand.u32 2147483648, %v3814_v17  ;;  %vm606_vm14 = vweird.f32 %v3321_v54  ;;  %v609_v24 = vand.u32 2147483647, %v3814_v17  ;;  %v713_v15 = vadd.f32 0.014752088, %v712_v38 }
  0xf0   : > { %v3818_v6 = vmin.f32 %v777_v46, 16.0  ;;  %v742_v12 = vadd.f32 0.0036580483, %v741_v61  ;;  %v3149_v46 = vld [vmem:[%s4555_s4 + $0x60] sm:$0xff]  ;;  %v638_v23 = vmul.f32 %v637_v58, %v3709_v8  ;;  %v603_v21 = vmul.f32 %v3321_v54, %v602_v53  ;;  %1576 = vmatpush.bf16.msra.mxu3 %v3155_v39 }
  0xf1   : > { %v407_v28 = vpop.f32.mrf.mxu0  ;;  %1452 = vmatpush.bf16.msra.mxu2 %v3149_v46  ;;  %v1099_v25 = vadd.f32 1.0, %v2635_v7  ;;  %vm605_vm15 = vweird.f32 %v3814_v17  ;;  %v612_v40 = vor.u32 1.1754944e-38, %v611_v44  ;;  %vm610_vm1 = vcmp.eq.f32.partialorder %v609_v24, 8.507059e+37 }
  0xf2   : > { %v779_v35 = vmul.f32 2.1237322e-06, %v3818_v6  ;;  %v3832_v34 = vadd.f32 %v3591_v32, %v407_v28  ;;  %v3867_v27 = vadd.f32 1.0, %v638_v23  ;;  %v743_v28 = vmul.f32 %v742_v12, %v3782_v49  ;;  %vm607_vm0 = vmor %vm605_vm15, %vm606_vm14 }
  0xf3   : > { %v3135_v62 = vld [vmem:[#allocation2 + $0x30] sm:$0xff]  ;;  %v604_v30 = vadd.f32 %v3321_v54, %v603_v21  ;;  %v670_v52 = vmul.f32 3.8918573e-05, %v3737_v48  ;;  %v705_v61 = vmul.f32 %v704_v4, %v3757_v5  ;;  %v1115_v50 = vmul.f32 %v1099_v25, %v427_v56  ;;  %v1163_v25 = vpop.permute.xlu2 %1162 }
  0xf4   : > { %v3837_v47 = vmul.f32 0.70710677, %v3832_v34  ;;  %v780_v59 = vadd.f32 0.00028619796, %v779_v35  ;;  %1358 = vmatmul.bf16.vlgmr.msra.gmra.mxu1 %v3135_v62  ;;  %v714_v35 = vmul.f32 %v713_v15, %v3757_v5  ;;  %3322 = vrcp.f32 %v3867_v27 }
  0xf5   : > { %v608_v43 = vsel %vm607_vm0, %v3321_v54, %v604_v30  ;;  %1453 = vmatpush.bf16.msra.mxu2 %v3148_v36  ;;  %v744_v62 = vadd.f32 0.05243302, %v743_v28  ;;  %v428_v54 = vmul.f32 0.5, %v3650_v11  ;;  %v3891_v12 = vmul.f32 0.5, %v3675_v33 }
  0xf6   : > { %v817_v60 = vmul.f32 %v3837_v47, %v3837_v47  ;;  %v781_v16 = vmul.f32 %v780_v59, %v3818_v6  ;;  %v715_v58 = vadd.f32 0.112945676, %v714_v35  ;;  %v627_v46 = vmul.f32 %v3845_v0, %v3709_v8 }
  0xf7   : > { %v706_v11 = vadd.f32 0.18741608, %v705_v61  ;;  %v1227_v23 = vmul.f32 %v1158_v29, %v1115_v50  ;;  %vm645_vm2 = vweird.f32 %v3867_v27  ;;  %vm1504_vm8 = vsmask.f32 7424 }
  0xf8   : > { %v3849_v10 = vmin.f32 %v817_v60, 16.0  ;;  %v782_v41 = vadd.f32 0.0036580483, %v781_v16  ;;  %v613_v60 = vsel %vm610_vm1, %v612_v40, %v608_v43  ;;  %v666_v16 = vadd.f32 0.18741608, %v665_v55 }
  0xf9   : > { %v410_v14 = vpop.f32.mrf.mxu0  ;;  %v614_v1 = vmul.f32 %v613_v60, %v589_v63  ;;  %v671_v63 = vadd.f32 0.001143296, %v670_v52  ;;  %v649_v43 = vand.u32 2147483647, %v3867_v27 }
  0xfa   : > { %v819_v18 = vmul.f32 2.1237322e-06, %v3849_v10  ;;  %v3862_v22 = vadd.f32 %v3591_v32, %v410_v14  ;;  %v783_v53 = vmul.f32 %v782_v41, %v3818_v6  ;;  %v716_v14 = vmul.f32 %v715_v58, %v3757_v5  ;;  %v3323_v19 = vpop.eup %3322 }
  0xfb   : > { %v2636_v4 = vclamps-f32 %v614_v1, 1.0  ;;  %v641_v24 = vmul.f32 %v3323_v19, %v3867_v27  ;;  %v672_v55 = vmul.f32 %v671_v63, %v3737_v48  ;;  %v830_v36 = vmul.f32 3.8918573e-05, %v3849_v10 }
  0xfc   : > { %v820_v26 = vadd.f32 0.00028619796, %v819_v18  ;;  %v3871_v31 = vmul.f32 0.70710677, %v3862_v22  ;;  %v745_v18 = vmul.f32 %v744_v62, %v3782_v49  ;;  %v784_v15 = vadd.f32 0.05243302, %v783_v53 }
  0xfd   : > { %v1100_v21 = vadd.f32 1.0, %v2636_v4  ;;  %v717_v28 = vadd.f32 0.4994258, %v716_v14  ;;  %v642_v0 = vsub.f32 1.0, %v641_v24  ;;  %vm646_vm3 = vweird.f32 %v3323_v19 }
  0xfe   : > { %v821_v17 = vmul.f32 %v820_v26, %v3849_v10  ;;  %v857_v45 = vmul.f32 %v3871_v31, %v3871_v31  ;;  %v673_v40 = vadd.f32 0.014752088, %v672_v55  ;;  %v628_v1 = vadd.f32 1.1283791, %v627_v46  ;;  %vm3924_vm4 = vmor %vm645_vm2, %vm646_vm3 }
  0xff   : > { %v1116_v8 = vmul.f32 %v1100_v21, %v428_v54  ;;  %v718_v39 = vmul.f32 %v717_v28, %v3757_v5  ;;  %v831_v54 = vadd.f32 0.001143296, %v830_v36  ;;  %v667_v53 = vmul.f32 %v666_v16, %v3737_v48 }
 0x100   : > { %v822_v59 = vadd.f32 0.0036580483, %v821_v17  ;;  %v3887_v38 = vmin.f32 %v857_v45, 16.0  ;;  %v643_v17 = vmul.f32 %v3323_v19, %v642_v0  ;;  %v651_v45 = vand.u32 2147483648, %v3867_v27  ;;  %v3154_v0 = vld [vmem:[%s4555_s4 + $0x80] sm:$0xff] }
 0x101   : > { %v412_v7 = vpop.f32.mrf.mxu0  ;;  %v1228_v41 = vmul.f32 %v1163_v25, %v1116_v8  ;;  %v3917_v61 = vadd.f32 1.0, %v718_v39  ;;  %v674_v62 = vmul.f32 %v673_v40, %v3737_v48  ;;  %v3935_v63 = vmul.f32 0.5, %v3704_v2  ;;  %1577 = vmatpush.bf16.msra.mxu3 %v3154_v0 }
 0x102   : > { %v3895_v44 = vadd.f32 %v3591_v32, %v412_v7  ;;  %v823_v56 = vmul.f32 %v822_v59, %v3849_v10  ;;  %v859_v33 = vmul.f32 2.1237322e-06, %v3887_v38  ;;  %v644_v60 = vadd.f32 %v3323_v19, %v643_v17 }
 0x103   : > { %v3228_v59 = vpack.c.bf16 %v1228_v41, %v1227_v23  ;;  %3324 = vrcp.f32 %v3917_v61  ;;  %v3938_v27 = vmul.f32 0.5, %v3726_v37  ;;  %v652_v46 = vor.u32 1.1754944e-38, %v651_v45 }
 0x104   : > { %v3906_v26 = vmul.f32 0.70710677, %v3895_v44  ;;  %v824_v30 = vadd.f32 0.05243302, %v823_v56  ;;  %v860_v35 = vadd.f32 0.00028619796, %v859_v33  ;;  %v707_v56 = vmul.f32 %v706_v11, %v3757_v5 }
 0x105   : > { %3260 = vst [vmem:[#allocation2] sm:$0xff] %v3228_v59   ;;  %v648_v4 = vsel %vm3924_vm4, %v3323_v19, %v644_v60  ;;  %v675_v33 = vadd.f32 0.112945676, %v674_v62  ;;  %v746_v23 = vadd.f32 0.18741608, %v745_v18  ;;  %v785_v21 = vmul.f32 %v784_v15, %v3818_v6  ;;  %v3153_v60 = vld [vmem:[#allocation2 + $0x30] sm:$0xff] }
 0x106   : > { %v897_v29 = vmul.f32 %v3906_v26, %v3906_v26  ;;  %v825_v50 = vmul.f32 %v824_v30, %v3849_v10  ;;  %v861_v7 = vmul.f32 %v860_v35, %v3887_v38  ;;  %vm650_vm5 = vcmp.eq.f32.partialorder %v649_v43, 8.507059e+37 }
 0x107   : > { %v653_v11 = vsel %vm650_vm5, %v652_v46, %v648_v4  ;;  %v676_v24 = vmul.f32 %v675_v33, %v3737_v48  ;;  %v832_v19 = vmul.f32 %v831_v54, %v3849_v10  ;;  %v629_v25 = vmul.f32 %v628_v1, %v3679_v42  ;;  %v3147_v42 = vld [vmem:[%s4555_s4 + $0x50] sm:$0xff] }
 0x108   : > { %v3915_v52 = vmin.f32 %v897_v29, 16.0  ;;  %v826_v16 = vadd.f32 0.18741608, %v825_v50  ;;  %v862_v5 = vadd.f32 0.0036580483, %v861_v7  ;;  %v3947_v8 = vmul.f32 0.5, %v3763_v13  ;;  %1454 = vmatpush.bf16.msra.mxu2 %v3147_v42 }
 0x109   : > { %v668_v2 = vadd.f32 1.1283791, %v667_v53  ;;  %v708_v28 = vadd.f32 1.1283791, %v707_v56  ;;  %v3944_v37 = vpop.eup %3324  ;;  %v3950_v18 = vmul.f32 0.5, %v3785_v57  ;;  %v747_v55 = vmul.f32 %v746_v23, %v3782_v49  ;;  %v415_v17 = vpop.f32.mrf.mxu0 }
 0x10a   : > { %v899_v14 = vmul.f32 2.1237322e-06, %v3915_v52  ;;  %v677_v15 = vadd.f32 0.4994258, %v676_v24  ;;  %v786_v35 = vadd.f32 0.18741608, %v785_v21  ;;  %v654_v29 = vmul.f32 %v653_v11, %v629_v25 }
 0x10b   : > { %v721_v13 = vmul.f32 %v3944_v37, %v3917_v61  ;;  %v827_v39 = vmul.f32 %v826_v16, %v3849_v10  ;;  %v863_v57 = vmul.f32 %v862_v5, %v3887_v38  ;;  %v833_v40 = vadd.f32 0.014752088, %v832_v19 }
 0x10c   : > { %v900_v30 = vadd.f32 0.00028619796, %v899_v14  ;;  %v678_v36 = vmul.f32 %v677_v15, %v3737_v48  ;;  %v1275_v41 = vld [vmem:[#allocation2] sm:$0x3]  ;;  %v3965_v43 = vmul.f32 %v668_v2, %v3712_v9  ;;  %v3968_v45 = vmul.f32 %v708_v28, %v3741_v51  ;;  %v3146_v9 = vld [vmem:[%s4555_s4 + $0x48] sm:$0xff] }
 0x10d   : > { %v1297_v59 = vunpack.c.l.b16 %v1275_v41  ;;  %v722_v62 = vsub.f32 1.0, %v721_v13  ;;  %v3974_v48 = vadd.f32 %v3591_v32, %v415_v17  ;;  %v834_v7 = vmul.f32 %v833_v40, %v3849_v10  ;;  %v1478_v56 = vld [vmem:[#allocation2] sm:$0x7]  ;;  %1455 = vmatpush.bf16.msra.mxu2 %v3146_v9 }
 0x10e   : > { %v901_v50 = vmul.f32 %v900_v30, %v3915_v52  ;;  %v3971_v1 = vadd.f32 1.0, %v678_v36  ;;  %v3980_v58 = vadd.f32 1.1283791, %v747_v55  ;;  %v3983_v51 = vmul.f32 %v786_v35, %v3818_v6 }
 0x10f   : > { %v2637_v54 = vclamps-f32 %v654_v29, 1.0  ;;  %v1299_v53 = vpack.c.b16 %v1297_v59, %v1297_v59  ;;  %v3985_v4 = vadd.f32 1.1283791, %v827_v39  ;;  %v864_v14 = vadd.f32 0.05243302, %v863_v57 }
 0x110   : > { %v731_v46 = vand.u32 2147483648, %v3917_v61  ;;  %3326 = vrcp.f32 %v3971_v1  ;;  %v3990_v33 = vmul.f32 0.70710677, %v3974_v48  ;;  %v1506_v23 = vshrl.u32 %v3153_v60, 16 }
 0x111   : > { %1363 = vmatmul.bf16.gmra.mxu1 %v1299_v53  ;;  %v1508_v21 = vshll.u32 %v3153_v60, 16  ;;  %v750_v16 = vmul.f32 3.8918573e-05, %v3782_v49  ;;  %v902_v5 = vadd.f32 0.0036580483, %v901_v50  ;;  %v723_v11 = vmul.f32 %v3944_v37, %v722_v62 }
 0x112   : > { %v835_v24 = vadd.f32 0.112945676, %v834_v7  ;;  %v1501_v19 = vunpack.c.l.b16 %v1478_v56  ;;  %v1101_v25 = vadd.f32 1.0, %v2637_v54  ;;  %vm725_vm6 = vweird.f32 %v3917_v61 }
 0x113   : > { %v729_v2 = vand.u32 2147483647, %v3917_v61  ;;  %v937_v28 = vmul.f32 %v3990_v33, %v3990_v33  ;;  %v3999_v30 = vmul.f32 %v864_v14, %v3887_v38  ;;  %v732_v15 = vor.u32 1.1754944e-38, %v731_v46 }
 0x114   : > { %v836_v0 = vmul.f32 %v835_v24, %v3849_v10  ;;  %v4002_v42 = vpack.c.b16 %v1501_v19, %v1501_v19  ;;  %vm726_vm7 = vweird.f32 %v3944_v37  ;;  %v1510_v35 = vrot.slane %v1508_v21, 1 }
 0x115   : > { %v4005_v55 = vmin.f32 %v937_v28, 16.0  ;;  %v751_v29 = vadd.f32 0.001143296, %v750_v16  ;;  %v903_v39 = vmul.f32 %v902_v5, %v3915_v52  ;;  %v724_v57 = vadd.f32 %v3944_v37, %v723_v11  ;;  %vm4021_vm9 = vmor %vm725_vm6, %vm726_vm7  ;;  %v3145_v5 = vld [vmem:[%s4555_s4 + $0x40] sm:$0xff] }
 0x116   : > { %v3327_v13 = vpop.eup %3326  ;;  %v837_v36 = vadd.f32 0.4994258, %v836_v0  ;;  %v1513_v41 = vshll.u32 %v4002_v42, 16  ;;  %v1117_v17 = vmul.f32 %v1101_v25, %v3891_v12  ;;  %v689_v59 = vand.u32 2147483647, %v3971_v1  ;;  %v417_v0 = vpop.f32.mrf.mxu0  ;;  %1456 = vmatpush.bf16.msra.mxu2 %v3145_v5 }
 0x117   : > { %v681_v40 = vmul.f32 %v3327_v13, %v3971_v1  ;;  %v939_v50 = vmul.f32 2.1237322e-06, %v4005_v55  ;;  %v1511_v62 = vor.u32 %v1510_v35, %v1506_v23  ;;  %v691_v54 = vand.u32 2147483648, %v3971_v1  ;;  %v1168_v23 = vpop.permute.xlu1 %1167 }
 0x118   : > { %v838_v60 = vmul.f32 %v837_v36, %v3849_v10  ;;  %v4015_v7 = vrot.slane %v1513_v41, 1  ;;  %v752_v56 = vmul.f32 %v751_v29, %v3782_v49  ;;  %v728_v10 = vsel %vm4021_vm9, %v3944_v37, %v724_v57  ;;  %v3170_v36 = vld [vmem:[%s4555_s4 + $0xf8] sm:$0xff] }
 0x119   : > { %v682_v12 = vsub.f32 1.0, %v681_v40  ;;  %v940_v53 = vadd.f32 0.00028619796, %v939_v50  ;;  %v790_v61 = vmul.f32 3.8918573e-05, %v3818_v6  ;;  %vm686_vm10 = vweird.f32 %v3327_v13  ;;  %1675 = vmatpush.bf16.msrb.mxu1 %v3170_v36 }
 0x11a   : > { %v4030_v14 = vadd.f32 1.0, %v838_v60  ;;  %v1516_v46 = vsel %vm1504_vm8, %v1511_v62, %v4015_v7  ;;  %v753_v16 = vadd.f32 0.014752088, %v752_v56  ;;  %v870_v11 = vmul.f32 3.8918573e-05, %v3887_v38 }
 0x11b   : > { %v683_v21 = vmul.f32 %v3327_v13, %v682_v12  ;;  %1578 = vmatmul.bf16.vlgmr.msra.gmra.mxu3 %v1516_v46  ;;  %v4039_v24 = vadd.f32 0.05243302, %v903_v39  ;;  %vm730_vm11 = vcmp.eq.f32.partialorder %v729_v2, 8.507059e+37  ;;  %vm685_vm12 = vweird.f32 %v3971_v1 }
 0x11c   : > { %3328 = vrcp.f32 %v4030_v14  ;;  %v733_v37 = vsel %vm730_vm11, %v732_v15, %v728_v10  ;;  %v941_v25 = vmul.f32 %v940_v53, %v4005_v55  ;;  %v754_v28 = vmul.f32 %v753_v16, %v3782_v49  ;;  %vm687_vm13 = vmor %vm685_vm12, %vm686_vm10  ;;  %v3169_v10 = vld [vmem:[%s4555_s4 + $0xf0] sm:$0xff] }
 0x11d   : > { %v684_v19 = vadd.f32 %v3327_v13, %v683_v21  ;;  %v4045_v35 = vmul.f32 %v1168_v23, %v1117_v17  ;;  %v692_v29 = vor.u32 1.1754944e-38, %v691_v54  ;;  %v4049_v39 = vadd.f32 %v3591_v32, %v417_v0  ;;  %1676 = vmatpush.bf16.msrb.mxu1 %v3169_v10 }
 0x11e   : > { %v791_v2 = vadd.f32 0.001143296, %v790_v61  ;;  %vm690_vm14 = vcmp.eq.f32.partialorder %v689_v59, 8.507059e+37  ;;  %v755_v57 = vadd.f32 0.112945676, %v754_v28  ;;  %v4055_v41 = vmul.f32 %v733_v37, %v3968_v45 }
 0x11f   : > { %v688_v1 = vsel %vm687_vm13, %v3327_v13, %v684_v19  ;;  %v871_v15 = vadd.f32 0.001143296, %v870_v11  ;;  %v4058_v40 = vmul.f32 0.70710677, %v4049_v39  ;;  %v942_v60 = vadd.f32 0.0036580483, %v941_v25  ;;  %v1173_v37 = vpop.permute.xlu1 %1172 }
 0x120   : > { %v693_v17 = vsel %vm690_vm14, %v692_v29, %v688_v1  ;;  %v792_v50 = vmul.f32 %v791_v2, %v3818_v6  ;;  %v756_v13 = vmul.f32 %v755_v57, %v3782_v49  ;;  %v950_v12 = vmul.f32 3.8918573e-05, %v4005_v55  ;;  %v3168_v57 = vld [vmem:[%s4555_s4 + $0xe8] sm:$0xff] }
 0x121   : > { %v694_v32 = vmul.f32 %v693_v17, %v3965_v43  ;;  %v872_v59 = vmul.f32 %v871_v15, %v3887_v38  ;;  %v977_v9 = vmul.f32 %v4058_v40, %v4058_v40  ;;  %v1517_v54 = vshrl.u32 %v4002_v42, 16  ;;  %1677 = vmatpush.bf16.msrb.mxu1 %v3168_v57  ;;  %v3167_v57 = vld [vmem:[%s4555_s4 + $0xe0] sm:$0xff] }
 0x122   : > { %v3329_v62 = vpop.eup %3328  ;;  %v793_v45 = vadd.f32 0.014752088, %v792_v50  ;;  %vm845_vm15 = vweird.f32 %v4030_v14  ;;  %v851_v43 = vand.u32 2147483648, %v4030_v14  ;;  %v757_v46 = vadd.f32 0.4994258, %v756_v13 }
 0x123   : > { %v2638_v53 = vclamps-f32 %v694_v32, 1.0  ;;  %v841_v56 = vmul.f32 %v3329_v62, %v4030_v14  ;;  %v4074_v61 = vmin.f32 %v977_v9, 16.0  ;;  %v873_v21 = vadd.f32 0.014752088, %v872_v59 }
 0x124   : > { %v794_v23 = vmul.f32 %v793_v45, %v3818_v6  ;;  %v943_v42 = vmul.f32 %v942_v60, %v4005_v55  ;;  %v951_v11 = vadd.f32 0.001143296, %v950_v12  ;;  %v758_v19 = vmul.f32 %v757_v46, %v3782_v49 }
 0x125   : > { %v1102_v16 = vadd.f32 1.0, %v2638_v53  ;;  %v842_v5 = vsub.f32 1.0, %v841_v56  ;;  %v979_v25 = vmul.f32 2.1237322e-06, %v4074_v61  ;;  %v874_v0 = vmul.f32 %v873_v21, %v3887_v38  ;;  %1678 = vmatpush.bf16.msrb.mxu1 %v3167_v57 }
 0x126   : > { %v795_v28 = vadd.f32 0.112945676, %v794_v23  ;;  %vm846_vm0 = vweird.f32 %v3329_v62  ;;  %v952_v1 = vmul.f32 %v951_v11, %v4005_v55  ;;  %v849_v15 = vand.u32 2147483647, %v4030_v14  ;;  %v420_v23 = vpop.f32.mrf.mxu0 }
 0x127   : > { %v1118_v29 = vmul.f32 %v1102_v16, %v3935_v63  ;;  %v843_v2 = vmul.f32 %v3329_v62, %v842_v5  ;;  %v4087_v36 = vadd.f32 1.0, %v758_v19  ;;  %v1519_v17 = vor.u32 %v1517_v54, %v4015_v7  ;;  %vm847_vm1 = vmor %vm845_vm15, %vm846_vm0 }
 0x128   : > { %v796_v49 = vmul.f32 %v795_v28, %v3818_v6  ;;  %v875_v60 = vadd.f32 0.112945676, %v874_v0  ;;  %v953_v63 = vadd.f32 0.014752088, %v952_v1  ;;  %v2639_v13 = vclamps-f32 %v4055_v41, 1.0 }
 0x129   : > { %v1230_v50 = vmul.f32 %v1173_v37, %v1118_v29  ;;  %v844_v32 = vadd.f32 %v3329_v62, %v843_v2  ;;  %v944_v59 = vadd.f32 0.05243302, %v943_v42  ;;  %3330 = vrcp.f32 %v4087_v36  ;;  %v4117_v37 = vld [vmem:[%s4554_s3] ss:$0 sm:$0xff] }
 0x12a   : > { %v980_v9 = vadd.f32 0.00028619796, %v979_v25  ;;  %v905_v45 = vmul.f32 %v4039_v24, %v3915_v52  ;;  %v852_v54 = vor.u32 1.1754944e-38, %v851_v43  ;;  %v788_v53 = vadd.f32 1.1283791, %v3983_v51 }
 0x12b   : > { %v3233_v12 = vpack.c.bf16 %v1230_v50, %v4045_v35  ;;  %v848_v7 = vsel %vm847_vm1, %v3329_v62, %v844_v32  ;;  %1583 = vmatmul.bf16.gmra.mxu3 %v1519_v17  ;;  %v829_v41 = vmul.f32 %v3985_v4, %v3837_v47  ;;  %vm850_vm2 = vcmp.eq.f32.partialorder %v849_v15, 8.507059e+37  ;;  %v1178_v32 = vpop.permute.xlu0 %1177 }
 0x12c   : > { %v797_v56 = vadd.f32 0.4994258, %v796_v49  ;;  %v866_v14 = vadd.f32 0.18741608, %v3999_v30  ;;  %v853_v10 = vsel %vm850_vm2, %v852_v54, %v848_v7  ;;  %v876_v46 = vmul.f32 %v875_v60, %v3887_v38  ;;  %v3166_v54 = vld [vmem:[%s4555_s4 + $0xd8] sm:$0xff] }
 0x12d   : > { %3261 = vst [vmem:[#allocation2 + $0x18] sm:$0xff] %v3233_v12   ;;  %v954_v24 = vmul.f32 %v953_v63, %v4005_v55  ;;  %v1103_v35 = vadd.f32 1.0, %v2639_v13  ;;  %v945_v62 = vmul.f32 %v944_v59, %v4005_v55  ;;  %v981_v43 = vmul.f32 %v980_v9, %v4074_v61  ;;  %1679 = vmatpush.bf16.msrb.mxu1 %v3166_v54  ;;  %v1183_v54 = vpop.permute.xlu1 %1182 }
 0x12e   : > { %v798_v51 = vmul.f32 %v797_v56, %v3818_v6  ;;  %v749_v47 = vmul.f32 %v3980_v58, %v3773_v20  ;;  %v4110_v4 = vmul.f32 0.5, %v3832_v34  ;;  %v906_v30 = vadd.f32 0.18741608, %v905_v45 }
 0x12f   : > { %v877_v21 = vadd.f32 0.4994258, %v876_v46  ;;  %v3331_v16 = vpop.eup %3330  ;;  %v854_v42 = vmul.f32 %v853_v10, %v829_v41  ;;  %v955_v11 = vadd.f32 0.112945676, %v954_v24  ;;  %v4120_v6 = vadd.f32 %v4117_v37, %v420_v23 }
 0x130   : > { %v4112_v5 = vadd.f32 1.0, %v798_v51  ;;  %v4123_v20 = vmul.f32 %v788_v53, %v3794_v3  ;;  %v4126_v34 = vmul.f32 %v866_v14, %v3887_v38  ;;  %v761_v58 = vmul.f32 %v3331_v16, %v4087_v36 }
 0x131   : > { %v990_v19 = vmul.f32 3.8918573e-05, %v4074_v61  ;;  %v1119_v25 = vmul.f32 %v1103_v35, %v3938_v27  ;;  %v946_v28 = vadd.f32 0.18741608, %v945_v62  ;;  %v982_v0 = vadd.f32 0.0036580483, %v981_v43 }
 0x132   : > { %3332 = vrcp.f32 %v4112_v5  ;;  %v4133_v29 = vmul.f32 %v906_v30, %v3915_v52  ;;  %v762_v2 = vsub.f32 1.0, %v761_v58  ;;  %v771_v3 = vand.u32 2147483648, %v4087_v36 }
 0x133   : > { %v878_v1 = vmul.f32 %v877_v21, %v3887_v38  ;;  %v2642_v15 = vclamps-f32 %v854_v42, 1.0  ;;  %v769_v49 = vand.u32 2147483647, %v4087_v36  ;;  %v956_v17 = vmul.f32 %v955_v11, %v4005_v55 }
 0x134   : > { %v3144_v27 = vld [vmem:[#allocation2 + $0x18] sm:$0xff]  ;;  %v4143_v50 = vmul.f32 0.70710677, %v4120_v6  ;;  %v763_v60 = vmul.f32 %v3331_v16, %v762_v2  ;;  %vm766_vm3 = vweird.f32 %v3331_v16  ;;  %v991_v13 = vadd.f32 0.001143296, %v990_v19 }
 0x135   : > { %v4145_v63 = vadd.f32 1.0, %v878_v1  ;;  %v4147_v38 = vmul.f32 %v1178_v32, %v1119_v25  ;;  %v947_v59 = vmul.f32 %v946_v28, %v4005_v55  ;;  %v983_v9 = vmul.f32 %v982_v0, %v4074_v61  ;;  %1457 = vmatmul.bf16.vlgmr.msra.gmra.mxu2 %v3144_v27  ;;  %v1193_v1 = vpop.permute.xlu0 %1192 }
 0x136   : > { %v957_v45 = vadd.f32 0.4994258, %v956_v17  ;;  %v764_v12 = vadd.f32 %v3331_v16, %v763_v60  ;;  %vm765_vm4 = vweird.f32 %v4087_v36  ;;  %v772_v7 = vor.u32 1.1754944e-38, %v771_v3  ;;  %v422_v3 = vpop.f32.mrf.mxu0 }
 0x137   : > { %3334 = vrcp.f32 %v4145_v63  ;;  %v1106_v41 = vadd.f32 1.0, %v2642_v15  ;;  %vm767_vm5 = vmor %vm765_vm4, %vm766_vm3  ;;  %v1017_v14 = vmul.f32 %v4143_v50, %v4143_v50  ;;  %v910_v10 = vmul.f32 3.8918573e-05, %v3915_v52 }
 0x138   : > { %v3333_v53 = vpop.eup %3332  ;;  %v958_v56 = vmul.f32 %v957_v45, %v4005_v55  ;;  %v768_v46 = vsel %vm767_vm5, %v3331_v16, %v764_v12  ;;  %vm770_vm6 = vcmp.eq.f32.partialorder %v769_v49, 8.507059e+37  ;;  %v992_v24 = vmul.f32 %v991_v13, %v4074_v61  ;;  %v3165_v16 = vld [vmem:[%s4555_s4 + $0xd0] sm:$0xff] }
 0x139   : > { %v801_v36 = vmul.f32 %v3333_v53, %v4112_v5  ;;  %v948_v23 = vadd.f32 1.1283791, %v947_v59  ;;  %v773_v35 = vsel %vm770_vm6, %v772_v7, %v768_v46  ;;  %v984_v62 = vadd.f32 0.05243302, %v983_v9  ;;  %1680 = vmatpush.bf16.msrb.mxu1 %v3165_v16 }
 0x13a   : > { %v4163_v43 = vadd.f32 1.0, %v958_v56  ;;  %v774_v51 = vmul.f32 %v773_v35, %v749_v47  ;;  %v809_v55 = vand.u32 2147483647, %v4112_v5  ;;  %v811_v21 = vand.u32 2147483648, %v4112_v5 }
 0x13b   : > { %v802_v30 = vsub.f32 1.0, %v801_v36  ;;  %v1122_v42 = vmul.f32 %v1106_v41, %v4110_v4  ;;  %v4172_v11 = vmin.f32 %v1017_v14, 16.0  ;;  %v911_v58 = vadd.f32 0.001143296, %v910_v10 }
 0x13c   : > { %3336 = vrcp.f32 %v4163_v43  ;;  %v2640_v25 = vclamps-f32 %v774_v51, 1.0  ;;  %vm806_vm7 = vweird.f32 %v3333_v53  ;;  %v993_v28 = vadd.f32 0.014752088, %v992_v24  ;;  %v3163_v24 = vld [vmem:[%s4555_s4 + $0xc0] sm:$0xff] }
 0x13d   : > { %v4174_v19 = vpop.eup %3334  ;;  %v803_v47 = vmul.f32 %v3333_v53, %v802_v30  ;;  %v4177_v0 = vmul.f32 %v948_v23, %v3990_v33  ;;  %v985_v2 = vmul.f32 %v984_v62, %v4074_v61  ;;  %vm805_vm9 = vweird.f32 %v4112_v5  ;;  %v3188_v33 = vld [vmem:[%s4555_s4 + $0x178] sm:$0xff]  ;;  %v3164_v5 = vld [vmem:[%s4555_s4 + $0xc8] sm:$0xff] }
 0x13e   : > { %v881_v4 = vmul.f32 %v4174_v19, %v4145_v63  ;;  %v1104_v57 = vadd.f32 1.0, %v2640_v25  ;;  %vm4183_vm10 = vcmp.eq.f32.partialorder %v809_v55, 8.507059e+37  ;;  %v994_v27 = vmul.f32 %v993_v28, %v4074_v61  ;;  %vm807_vm11 = vmor %vm805_vm9, %vm806_vm7  ;;  %1900 = vmatpush.bf16.msrb.mxu3 %v3188_v33  ;;  %1681 = vmatpush.bf16.msrb.mxu1 %v3164_v5 }
 0x13f   : > { %v804_v15 = vadd.f32 %v3333_v53, %v803_v47  ;;  %v4194_v17 = vmul.f32 %v1193_v1, %v1122_v42  ;;  %v812_v32 = vor.u32 1.1754944e-38, %v811_v21  ;;  %v1019_v60 = vmul.f32 2.1237322e-06, %v4172_v11 }
 0x140   : > { %v912_v13 = vmul.f32 %v911_v58, %v3915_v52  ;;  %v1120_v59 = vmul.f32 %v1104_v57, %v3947_v8  ;;  %v995_v45 = vadd.f32 0.112945676, %v994_v27  ;;  %v4201_v12 = vadd.f32 %v4117_v37, %v422_v3  ;;  %v3179_v3 = vld [vmem:[%s4555_s4 + $0x138] sm:$0xff] }
 0x141   : > { %v808_v9 = vsel %vm807_vm11, %v3333_v53, %v804_v15  ;;  %v986_v41 = vadd.f32 0.18741608, %v985_v2  ;;  %v882_v14 = vsub.f32 1.0, %v881_v4  ;;  %v889_v8 = vand.u32 2147483647, %v4145_v63  ;;  %v3187_v53 = vld [vmem:[%s4555_s4 + $0x170] sm:$0xff]  ;;  %1780 = vmatpush.bf16.msrb.mxu2 %v3179_v3 }
 0x142   : > { %v4203_v7 = vpop.eup %3336  ;;  %v813_v56 = vsel %vm4183_vm10, %v812_v32, %v808_v9  ;;  %v913_v10 = vadd.f32 0.014752088, %v912_v13  ;;  %v1232_v46 = vmul.f32 %v1183_v54, %v1120_v59  ;;  %v891_v23 = vand.u32 2147483648, %v4145_v63  ;;  %1901 = vmatpush.bf16.msrb.mxu3 %v3187_v53  ;;  %1682 = vmatpush.bf16.msrb.mxu1 %v3163_v24  ;;  %v3186_v4 = vld [vmem:[%s4555_s4 + $0x168] sm:$0xff]  ;;  %v1188_v32 = vpop.permute.xlu2 %1187 }
 0x143   : > { %v814_v36 = vmul.f32 %v813_v56, %v4123_v20  ;;  %v961_v37 = vmul.f32 %v4203_v7, %v4163_v43  ;;  %v1020_v35 = vadd.f32 0.00028619796, %v1019_v60  ;;  %v996_v62 = vmul.f32 %v995_v45, %v4074_v61  ;;  %v3185_v56 = vld [vmem:[%s4555_s4 + $0x160] sm:$0xff] }
 0x144   : > { %v914_v20 = vmul.f32 %v913_v10, %v3915_v52  ;;  %v3238_v51 = vpack.c.bf16 %v1232_v46, %v4147_v38  ;;  %v4222_v21 = vmul.f32 0.70710677, %v4201_v12  ;;  %v883_v16 = vmul.f32 %v4174_v19, %v882_v14  ;;  %v3178_v14 = vld [vmem:[%s4555_s4 + $0x130] sm:$0xff]  ;;  %v3182_v10 = vld [vmem:[%s4555_s4 + $0x148] sm:$0xff] }
 0x145   : > { %v2641_v30 = vclamps-f32 %v814_v36, 1.0  ;;  %v962_v55 = vsub.f32 1.0, %v961_v37  ;;  %v969_v42 = vand.u32 2147483647, %v4163_v43  ;;  %v997_v58 = vadd.f32 0.4994258, %v996_v62  ;;  %1781 = vmatpush.bf16.msrb.mxu2 %v3178_v14 }
 0x146   : > { %v915_v25 = vadd.f32 0.112945676, %v914_v20  ;;  %3262 = vst [vmem:[#allocation2 + $0x10] sm:$0xff] %v3238_v51   ;;  %v1057_v38 = vmul.f32 %v4222_v21, %v4222_v21  ;;  %v1030_v2 = vmul.f32 3.8918573e-05, %v4172_v11  ;;  %v971_v1 = vand.u32 2147483648, %v4163_v43  ;;  %1902 = vmatpush.bf16.msrb.mxu3 %v3186_v4 }
 0x147   : > { %v1105_v47 = vadd.f32 1.0, %v2641_v30  ;;  %v963_v28 = vmul.f32 %v4203_v7, %v962_v55  ;;  %v1021_v57 = vmul.f32 %v1020_v35, %v4172_v11  ;;  %v998_v15 = vmul.f32 %v997_v58, %v4074_v61  ;;  %v3197_v62 = vld [vmem:[%s4555_s4 + $0x1b0] sm:$0xff] }
 0x148   : > { %v916_v49 = vmul.f32 %v915_v25, %v3915_v52  ;;  %vm966_vm12 = vweird.f32 %v4203_v7  ;;  %v4243_v5 = vmin.f32 %v1057_v38, 16.0  ;;  %v884_v60 = vadd.f32 %v4174_v19, %v883_v16  ;;  %v3177_v16 = vld [vmem:[%s4555_s4 + $0x128] sm:$0xff] }
 0x149   : > { %v1121_v27 = vmul.f32 %v1105_v47, %v3950_v18  ;;  %v964_v33 = vadd.f32 %v4203_v7, %v963_v28  ;;  %vm886_vm13 = vweird.f32 %v4174_v19  ;;  %v4247_v13 = vadd.f32 1.0, %v998_v15  ;;  %v3198_v18 = vld [vmem:[%s4555_s4 + $0x1b8] sm:$0xff]  ;;  %1782 = vmatpush.bf16.msrb.mxu2 %v3177_v16 }
 0x14a   : > { %v917_v59 = vadd.f32 0.4994258, %v916_v49  ;;  %vm965_vm14 = vweird.f32 %v4163_v43  ;;  %v1059_v45 = vmul.f32 2.1237322e-06, %v4243_v5  ;;  %v1031_v54 = vadd.f32 0.001143296, %v1030_v2  ;;  %2026 = vmatpush.bf16.msra.mxu1 %v3198_v18  ;;  %1903 = vmatpush.bf16.msrb.mxu3 %v3185_v56 }
 0x14b   : > { %v1233_v9 = vmul.f32 %v1188_v32, %v1121_v27  ;;  %vm885_vm15 = vweird.f32 %v4145_v63  ;;  %vm4263_vm0 = vmor %vm965_vm14, %vm966_vm12  ;;  %v1022_v43 = vadd.f32 0.0036580483, %v1021_v57  ;;  %3338 = vrcp.f32 %v4247_v13  ;;  %v3196_v2 = vld [vmem:[%s4555_s4 + $0x1a8] sm:$0xff] }
 0x14c   : > { %v1070_v46 = vmul.f32 3.8918573e-05, %v4243_v5  ;;  %v868_v36 = vadd.f32 1.1283791, %v4126_v34  ;;  %v987_v37 = vmul.f32 %v986_v41, %v4074_v61  ;;  %vm4274_vm1 = vmor %vm885_vm15, %vm886_vm13  ;;  %v968_v24 = vsel %vm4263_vm0, %v4203_v7, %v964_v33 }
 0x14d   : > { %v3243_v53 = vpack.c.bf16 %v4194_v17, %v1233_v9  ;;  %v888_v34 = vsel %vm4274_vm1, %v4174_v19, %v884_v60  ;;  %vm4284_vm2 = vcmp.eq.f32.partialorder %v889_v8, 8.507059e+37  ;;  %v972_v17 = vor.u32 1.1754944e-38, %v971_v1  ;;  %v1373_v35 = vld [vmem:[#allocation2 + $0x10] sm:$0x3]  ;;  %v3184_v19 = vld [vmem:[%s4555_s4 + $0x158] sm:$0xff] }
 0x14e   : > { %v918_v41 = vmul.f32 %v917_v59, %v3915_v52  ;;  %v892_v7 = vor.u32 1.1754944e-38, %v891_v23  ;;  %vm970_vm3 = vcmp.eq.f32.partialorder %v969_v42, 8.507059e+37  ;;  %v1060_v20 = vadd.f32 0.00028619796, %v1059_v45  ;;  %2027 = vmatpush.bf16.msra.mxu1 %v3197_v62  ;;  %1904 = vmatpush.bf16.msrb.mxu3 %v3184_v19  ;;  %v3195_v45 = vld [vmem:[%s4555_s4 + $0x1a0] sm:$0xff]  ;;  %v3194_v62 = vld [vmem:[%s4555_s4 + $0x198] sm:$0xff] }
 0x14f   : > { %3263 = vst [vmem:[#allocation2 + $0x8] sm:$0xff] %v3243_v53   ;;  %v1032_v51 = vmul.f32 %v1031_v54, %v4172_v11  ;;  %v973_v8 = vsel %vm970_vm3, %v972_v17, %v968_v24  ;;  %v1023_v30 = vmul.f32 %v1022_v43, %v4172_v11  ;;  %v1071_v52 = vadd.f32 0.001143296, %v1070_v46  ;;  %v3175_v43 = vld [vmem:[%s4555_s4 + $0x118] sm:$0xff]  ;;  %v3174_v19 = vld [vmem:[%s4555_s4 + $0x110] sm:$0xff] }
 0x150   : > { %v4297_v55 = vadd.f32 1.0, %v918_v41  ;;  %v893_v23 = vsel %vm4284_vm2, %v892_v7, %v888_v34  ;;  %v1061_v42 = vmul.f32 %v1060_v20, %v4243_v5  ;;  %v1396_v25 = vunpack.c.l.b16 %v1373_v35 }
 0x151   : > { %v1033_v58 = vadd.f32 0.014752088, %v1032_v51  ;;  %v3339_v47 = vpop.eup %3338  ;;  %v869_v28 = vmul.f32 %v868_v36, %v3871_v31  ;;  %v4307_v38 = vmul.f32 0.5, %v3974_v48  ;;  %v4314_v4 = vadd.f32 1.1283791, %v4133_v29  ;;  %v3183_v31 = vld [vmem:[%s4555_s4 + $0x150] sm:$0xff] }
 0x152   : > { %3340 = vrcp.f32 %v4297_v55  ;;  %v988_v3 = vadd.f32 1.1283791, %v987_v37  ;;  %v974_v1 = vmul.f32 %v973_v8, %v4177_v0  ;;  %v1001_v57 = vmul.f32 %v3339_v47, %v4247_v13  ;;  %v3176_v48 = vld [vmem:[%s4555_s4 + $0x120] sm:$0xff]  ;;  %2028 = vmatpush.bf16.msra.mxu1 %v3196_v2  ;;  %1905 = vmatpush.bf16.msrb.mxu3 %v3183_v31 }
 0x153   : > { %v4324_v15 = vmul.f32 %v893_v23, %v869_v28  ;;  %v1024_v49 = vadd.f32 0.05243302, %v1023_v30  ;;  %v1072_v27 = vmul.f32 %v1071_v52, %v4243_v5  ;;  %v1034_v29 = vmul.f32 %v1033_v58, %v4172_v11  ;;  %1783 = vmatpush.bf16.msrb.mxu2 %v3176_v48  ;;  %v3181_v51 = vld [vmem:[%s4555_s4 + $0x140] sm:$0xff]  ;;  %v1208_v48 = vpop.permute.xlu1 %1207 }
 0x154   : > { %v1002_v33 = vsub.f32 1.0, %v1001_v57  ;;  %v1011_v0 = vand.u32 2147483648, %v4247_v13  ;;  %v1062_v32 = vadd.f32 0.0036580483, %v1061_v42  ;;  %v1398_v60 = vpack.c.b16 %v1396_v25, %v1396_v25 }
 0x155   : > { %v1073_v59 = vadd.f32 0.014752088, %v1072_v27  ;;  %v1035_v18 = vadd.f32 0.112945676, %v1034_v29  ;;  %v2645_v54 = vclamps-f32 %v974_v1, 1.0  ;;  %vm1006_vm4 = vweird.f32 %v3339_v47 }
 0x156   : > { %v3162_v9 = vld [vmem:[#allocation2 + $0x8] sm:$0xff]  ;;  %v1003_v56 = vmul.f32 %v3339_v47, %v1002_v33  ;;  %v1009_v14 = vand.u32 2147483647, %v4247_v13  ;;  %1462 = vmatmul.bf16.gmra.mxu2 %v1398_v60  ;;  %v989_v36 = vmul.f32 %v988_v3, %v4058_v40  ;;  %v1025_v37 = vmul.f32 %v1024_v49, %v4172_v11  ;;  %2029 = vmatpush.bf16.msra.mxu1 %v3195_v45  ;;  %v3193_v3 = vld [vmem:[%s4555_s4 + $0x190] sm:$0xff] }
 0x157   : > { %v1074_v53 = vmul.f32 %v1073_v59, %v4243_v5  ;;  %v1036_v63 = vmul.f32 %v1035_v18, %v4172_v11  ;;  %1683 = vmatmul.bf16.vlgmr.msrb.gmra.mxu1 %v3162_v9  ;;  %v2643_v24 = vclamps-f32 %v4324_v15, 1.0  ;;  %vm1005_vm5 = vweird.f32 %v4247_v13  ;;  %1906 = vmatpush.bf16.msrb.mxu3 %v3182_v10  ;;  %v3192_v33 = vld [vmem:[%s4555_s4 + $0x188] sm:$0xff] }
 0x158   : > { %v4339_v46 = vpop.eup %3340  ;;  %v1004_v34 = vadd.f32 %v3339_v47, %v1003_v56  ;;  %vm1007_vm6 = vmor %vm1005_vm5, %vm1006_vm4  ;;  %v1012_v40 = vor.u32 1.1754944e-38, %v1011_v0  ;;  %v1063_v17 = vmul.f32 %v1062_v32, %v4243_v5  ;;  %1784 = vmatpush.bf16.msrb.mxu2 %v3175_v43  ;;  %v1109_v7 = vadd.f32 1.0, %v2645_v54  ;;  %v3217_v0 = vld [vmem:[%s4555_s4 + $0x230] sm:$0xff] }
 0x159   : > { %v921_v61 = vmul.f32 %v4339_v46, %v4297_v55  ;;  %v1075_v41 = vadd.f32 0.112945676, %v1074_v53  ;;  %v1037_v35 = vadd.f32 0.4994258, %v1036_v63  ;;  %vm1010_vm7 = vcmp.eq.f32.partialorder %v1009_v14, 8.507059e+37  ;;  %v1213_v14 = vpop.permute.xlu2 %1212 }
 0x15a   : > { %v1008_v20 = vsel %vm1007_vm6, %v3339_v47, %v1004_v34  ;;  %v931_v30 = vand.u32 2147483648, %v4297_v55  ;;  %vm926_vm9 = vweird.f32 %v4339_v46  ;;  %v929_v58 = vand.u32 2147483647, %v4297_v55  ;;  %2030 = vmatpush.bf16.msra.mxu1 %v3194_v62 }
 0x15b   : > { %v922_v13 = vsub.f32 1.0, %v921_v61  ;;  %v1013_v8 = vsel %vm1010_vm7, %v1012_v40, %v1008_v20  ;;  %v1076_v52 = vmul.f32 %v1075_v41, %v4243_v5  ;;  %v1038_v16 = vmul.f32 %v1037_v35, %v4172_v11  ;;  %1907 = vmatpush.bf16.msrb.mxu3 %v3181_v51  ;;  %v1203_v20 = vpop.permute.xlu1 %1202 }
 0x15c   : > { %v1014_v23 = vmul.f32 %v1013_v8, %v989_v36  ;;  %v909_v25 = vmul.f32 %v4314_v4, %v3906_v26  ;;  %v1064_v47 = vadd.f32 0.05243302, %v1063_v17  ;;  %1785 = vmatpush.bf16.msrb.mxu2 %v3174_v19  ;;  %v438_v1 = vmul.f32 0.5, %v4049_v39  ;;  %v3218_v26 = vld [vmem:[%s4555_s4 + $0x238] sm:$0xff]  ;;  %v3173_v4 = vld [vmem:[%s4555_s4 + $0x108] sm:$0xff]  ;;  %v3191_v36 = vld [vmem:[%s4555_s4 + $0x180] sm:$0xff]  ;;  %v1198_v17 = vpop.permute.xlu0 %1197 }
 0x15d   : > { %v923_v42 = vmul.f32 %v4339_v46, %v922_v13  ;;  %v1077_v28 = vadd.f32 0.4994258, %v1076_v52  ;;  %v4368_v2 = vadd.f32 1.0, %v1038_v16  ;;  %vm925_vm10 = vweird.f32 %v4297_v55  ;;  %v3208_v52 = vld [vmem:[%s4555_s4 + $0x1f8] sm:$0xff]  ;;  %v3215_v16 = vld [vmem:[%s4555_s4 + $0x220] sm:$0xff] }
 0x15e   : > { %v2646_v57 = vclamps-f32 %v1014_v23, 1.0  ;;  %v1026_v15 = vadd.f32 0.18741608, %v1025_v37  ;;  %vm927_vm11 = vmor %vm925_vm10, %vm926_vm9  ;;  %v932_v49 = vor.u32 1.1754944e-38, %v931_v30  ;;  %v1125_v55 = vmul.f32 %v1109_v7, %v4307_v38  ;;  %2031 = vmatpush.bf16.msra.mxu1 %v3193_v3  ;;  %v3172_v38 = vld [vmem:[%s4555_s4 + $0x100] sm:$0xff]  ;;  %v3216_v37 = vld [vmem:[%s4555_s4 + $0x228] sm:$0xff] }
 0x15f   : > { %v924_v31 = vadd.f32 %v4339_v46, %v923_v42  ;;  %v1078_v39 = vmul.f32 %v1077_v28, %v4243_v5  ;;  %3342 = vrcp.f32 %v4368_v2  ;;  %vm930_vm12 = vcmp.eq.f32.partialorder %v929_v58, 8.507059e+37  ;;  %2263 = vmatpush.bf16.msra.mxu3 %v3218_v26 }
 0x160   : > { %v1110_v27 = vadd.f32 1.0, %v2646_v57  ;;  %v1107_v32 = vadd.f32 1.0, %v2643_v24  ;;  %v1065_v59 = vmul.f32 %v1064_v47, %v4243_v5  ;;  %1786 = vmatpush.bf16.msrb.mxu2 %v3173_v4  ;;  %v435_v54 = vmul.f32 0.5, %v3862_v22  ;;  %v3214_v4 = vld [vmem:[%s4555_s4 + $0x218] sm:$0xff] }
 0x161   : > { %v928_v29 = vsel %vm927_vm11, %v4339_v46, %v924_v31  ;;  %v4395_v18 = vadd.f32 1.0, %v1078_v39  ;;  %v1027_v56 = vmul.f32 %v1026_v15, %v4172_v11  ;;  %v1237_v10 = vmul.f32 %v1208_v48, %v1125_v55  ;;  %v3213_v55 = vld [vmem:[%s4555_s4 + $0x210] sm:$0xff] }
 0x162   : > { %v933_v60 = vsel %vm930_vm12, %v932_v49, %v928_v29  ;;  %v1126_v9 = vmul.f32 %v1110_v27, %v438_v1  ;;  %2032 = vmatpush.bf16.msra.mxu1 %v3192_v33  ;;  %v1123_v22 = vmul.f32 %v1107_v32, %v435_v54  ;;  %v1066_v63 = vadd.f32 0.18741608, %v1065_v59  ;;  %v3206_v49 = vld [vmem:[%s4555_s4 + $0x1e8] sm:$0xff] }
 0x163   : > { %v934_v45 = vmul.f32 %v933_v60, %v909_v25  ;;  %3344 = vrcp.f32 %v4395_v18  ;;  %2264 = vmatpush.bf16.msra.mxu3 %v3217_v0  ;;  %v436_v11 = vmul.f32 0.5, %v3895_v44  ;;  %v1028_v40 = vadd.f32 1.1283791, %v1027_v56  ;;  %v3207_v25 = vld [vmem:[%s4555_s4 + $0x1f0] sm:$0xff] }
 0x164   : > { %v1238_v43 = vmul.f32 %v1213_v14, %v1126_v9  ;;  %1787 = vmatpush.bf16.msrb.mxu2 %v3172_v38  ;;  %v1235_v7 = vmul.f32 %v1198_v17, %v1123_v22  ;;  %v1067_v13 = vmul.f32 %v1066_v63, %v4243_v5  ;;  %v1049_v51 = vand.u32 2147483647, %v4368_v2  ;;  %v3204_v17 = vld [vmem:[%s4555_s4 + $0x1d8] sm:$0xff] }
 0x165   : > { %v2644_v46 = vclamps-f32 %v934_v45, 1.0  ;;  %v3343_v53 = vpop.eup %3342  ;;  %v1051_v44 = vand.u32 2147483648, %v4368_v2  ;;  %v1029_v23 = vmul.f32 %v1028_v40, %v4143_v50  ;;  %vm1045_vm14 = vweird.f32 %v4368_v2  ;;  %v3212_v45 = vld [vmem:[%s4555_s4 + $0x208] sm:$0xff] }
 0x166   : > { %v3253_v24 = vpack.c.bf16 %v1238_v43, %v1237_v10  ;;  %v1041_v61 = vmul.f32 %v3343_v53, %v4368_v2  ;;  %2033 = vmatpush.bf16.msra.mxu1 %v3191_v36  ;;  %vm1046_vm13 = vweird.f32 %v3343_v53  ;;  %v1068_v47 = vadd.f32 1.1283791, %v1067_v13  ;;  %v3180_v2 = vld [vmem:[#allocation2 + $0x8] sm:$0xff]  ;;  %v2967_v10 = vld [vmem:[#allocation2] sm:$0xf] }
 0x167   : > { %v1108_v34 = vadd.f32 1.0, %v2644_v46  ;;  %2265 = vmatpush.bf16.msra.mxu3 %v3216_v37  ;;  %v1091_v28 = vand.u32 2147483648, %v4395_v18  ;;  %vm1047_vm15 = vmor %vm1045_vm14, %vm1046_vm13  ;;  %vm1050_vm0 = vcmp.eq.f32.partialorder %v1049_v51, 8.507059e+37  ;;  %v1052_v3 = vor.u32 1.1754944e-38, %v1051_v44  ;;  %v3190_v43 = vld [vmem:[#allocation2] sm:$0x10] }
 0x168   : > { %3265 = vst [vmem:[#allocation2 + $0x28] sm:$0xff] %v3253_v24   ;;  %v1042_v35 = vsub.f32 1.0, %v1041_v61  ;;  %2151 = vmatpush.bf16.msra.mxu2 %v3208_v52  ;;  %v1089_v50 = vand.u32 2147483647, %v4395_v18  ;;  %vm1085_vm2 = vweird.f32 %v4395_v18  ;;  %v1069_v27 = vmul.f32 %v1068_v47, %v4222_v21  ;;  %v3189_v24 = vld [vmem:[#allocation2 + $0x30] sm:$0xf0] }
 0x169   : > { %v1124_v41 = vmul.f32 %v1108_v34, %v436_v11  ;;  %v3345_v62 = vpop.eup %3344  ;;  %v1092_v39 = vor.u32 1.1754944e-38, %v1091_v28  ;;  %v1838_v32 = vshll.u32 %v3180_v2, 16  ;;  %v439_v21 = vmul.f32 0.5, %v4120_v6  ;;  %v2963_v11 = vld [vmem:[#allocation2 + $0x30] sm:$0xc] }
 0x16a   : > { %v1081_v8 = vmul.f32 %v3345_v62, %v4395_v18  ;;  %v1043_v30 = vmul.f32 %v3343_v53, %v1042_v35  ;;  %vm1086_vm1 = vweird.f32 %v3345_v62  ;;  %vm1090_vm4 = vcmp.eq.f32.partialorder %v1089_v50, 8.507059e+37  ;;  %v3205_v18 = vld [vmem:[%s4555_s4 + $0x1e0] sm:$0xff]  ;;  %v1218_v35 = vpop.permute.xlu2 %1217  ;;  %v3203_v44 = vld [vmem:[%s4555_s4 + $0x1d0] sm:$0xff] }
 0x16b   : > { %v1236_v19 = vmul.f32 %v1203_v20, %v1124_v41  ;;  %2266 = vmatpush.bf16.msra.mxu3 %v3215_v16  ;;  %vm1087_vm3 = vmor %vm1085_vm2, %vm1086_vm1  ;;  %v440_v46 = vmul.f32 0.5, %v4201_v12  ;;  %v1840_v36 = vrot.slane %v1838_v32, 1  ;;  %v2968_v34 = vor.u32 %v3190_v43, %v2967_v10  ;;  %v3211_v12 = vld [vmem:[%s4555_s4 + $0x200] sm:$0xff]  ;;  %v1223_v41 = vpop.permute.xlu0 %1222 }
 0x16c   : > { %v1082_v42 = vsub.f32 1.0, %v1081_v8  ;;  %v1044_v58 = vadd.f32 %v3343_v53, %v1043_v30  ;;  %2152 = vmatpush.bf16.msra.mxu2 %v3207_v25  ;;  %v1836_v6 = vshrl.u32 %v3180_v2, 16  ;;  %vm2209_vm5 = vcmask 1044480  }
 0x16d   : > { %v3248_v5 = vpack.c.bf16 %v1236_v19, %v1235_v7  ;;  %v1968_v19 = vshrl.u32 %v2968_v34, 16  ;;  %v1971_v8 = vshll.u32 %v2968_v34, 16 }
 0x16e   : > { %v1083_v1 = vmul.f32 %v3345_v62, %v1082_v42  ;;  %v1048_v57 = vsel %vm1047_vm15, %v3343_v53, %v1044_v58  ;;  %v1841_v13 = vor.u32 %v1840_v36, %v1836_v6  ;;  %v3202_v42 = vld [vmem:[%s4555_s4 + $0x1c8] sm:$0xff] }
 0x16f   : > { %3264 = vst [vmem:[#allocation2 + $0x20] sm:$0xff] %v3248_v5   ;;  %v1053_v31 = vsel %vm1050_vm0, %v1052_v3, %v1048_v57  ;;  %v3171_v26 = vld [vmem:[#allocation2 + $0x28] sm:$0xff]  ;;  %2267 = vmatpush.bf16.msra.mxu3 %v3214_v4  ;;  %v1970_v58 = vrot.slane %v1968_v19, 2  ;;  %v1973_v25 = vrot.slane %v1971_v8, 3  ;;  %v3201_v3 = vld [vmem:[%s4555_s4 + $0x1c0] sm:$0xff] }
 0x170   : > { %v1084_v48 = vadd.f32 %v3345_v62, %v1083_v1  ;;  %v1054_v15 = vmul.f32 %v1053_v31, %v1029_v23  ;;  %1788 = vmatmul.bf16.vlgmr.msrb.gmra.mxu2 %v3171_v26  ;;  %v3023_v26 = vld [vmem:[#allocation2 + $0x10] sm:$0xf]  ;;  %v3200_v4 = vld [vmem:[#allocation2 + $0x10] sm:$0x10] }
 0x171   : > { %2153 = vmatpush.bf16.msra.mxu2 %v3206_v49  ;;  %v4457_v5 = vpop.f32.mrf.mxu1  ;;  %v1974_v1 = vor.u32 %v1973_v25, %v1970_v58  ;;  %v3019_v49 = vld [vmem:[#allocation2 + $0x18] sm:$0xc] }
 0x172   : > { %v1088_v29 = vsel %vm1087_vm3, %v3345_v62, %v1084_v48  ;;  %v2647_v33 = vclamps-f32 %v1054_v15, 1.0  ;;  %v2964_v62 = vor.u32 %v3189_v24, %v2963_v11 }
 0x173   : > { %v1093_v0 = vsel %vm1090_vm4, %v1092_v39, %v1088_v29  ;;  %2268 = vmatpush.bf16.msra.mxu3 %v3213_v55  ;;  %v3199_v39 = vld [vmem:[#allocation2 + $0x18] sm:$0xf0] }
 0x174   : > { %v1094_v60 = vmul.f32 %v1093_v0, %v1069_v27  ;;  %v1111_v59 = vadd.f32 1.0, %v2647_v33  ;;  %v1960_v16 = vshrl.u32 %v2964_v62, 16  ;;  %v1963_v23 = vshll.u32 %v2964_v62, 16 }
 0x175   : > { %2154 = vmatpush.bf16.msra.mxu2 %v3205_v18  ;;  %v3024_v27 = vor.u32 %v3200_v4, %v3023_v26  ;;  %v3020_v33 = vor.u32 %v3199_v39, %v3019_v49 }
 0x176   : > { %v1599_v38 = vld [vmem:[#allocation2 + $0x20] sm:$0x3]  ;;  %v2648_v54 = vclamps-f32 %v1094_v60, 1.0  ;;  %v1127_v53 = vmul.f32 %v1111_v59, %v439_v21  ;;  %v1962_v47 = vrot.slane %v1960_v16, 2  ;;  %v1965_v28 = vrot.slane %v1963_v23, 3 }
 0x177   : > { %v1809_v9 = vld [vmem:[#allocation2 + $0x20] sm:$0x7]  ;;  %v1622_v56 = vunpack.c.l.b16 %v1599_v38  ;;  %2269 = vmatpush.bf16.msra.mxu3 %v3212_v45  ;;  %v2093_v0 = vshrl.u32 %v3024_v27, 16  ;;  %v2096_v32 = vshll.u32 %v3024_v27, 16  ;;  %v2085_v59 = vshrl.u32 %v3020_v33, 16 }
 0x178   : > { %v1832_v14 = vunpack.c.l.b16 %v1809_v9  ;;  %v1112_v37 = vadd.f32 1.0, %v2648_v54  ;;  %v1239_v7 = vmul.f32 %v1218_v35, %v1127_v53  ;;  %v1966_v50 = vor.u32 %v1965_v28, %v1962_v47  ;;  %v3079_v38 = vld [vmem:[#allocation2] sm:$0xf]  ;;  %v3210_v9 = vld [vmem:[#allocation2] sm:$0x10] }
 0x179   : > { %v1624_v22 = vpack.c.b16 %v1622_v56, %v1622_v56  ;;  %2155 = vmatpush.bf16.msra.mxu2 %v3204_v17  ;;  %v1361_v31 = vpop.f32.mrf.mxu1  ;;  %v2088_v18 = vshll.u32 %v3020_v33, 16  ;;  %v2095_v45 = vrot.slane %v2093_v0, 2  ;;  %v2098_v21 = vrot.slane %v2096_v32, 3  ;;  %v3075_v54 = vld [vmem:[#allocation2 + $0x30] sm:$0x8] }
 0x17a   : > { %v1834_v63 = vpack.c.b16 %v1832_v14, %v1832_v14  ;;  %v1128_v61 = vmul.f32 %v1112_v37, %v440_v46  ;;  %v3209_v56 = vld [vmem:[#allocation2 + $0x30] sm:$0xf0]  ;;  %v2087_v14 = vrot.slane %v2085_v59, 2  ;;  %v3080_v43 = vor.u32 %v3210_v9, %v3079_v38 }
 0x17b   : > { %1688 = vmatmul.bf16.gmra.mxu1 %v1624_v22  ;;  %2270 = vmatpush.bf16.msra.mxu3 %v3211_v12  ;;  %v2090_v10 = vrot.slane %v2088_v18, 3  ;;  %v2099_v46 = vor.u32 %v2098_v21, %v2095_v45  ;;  %v3076_v37 = vor.u32 %v3209_v56, %v3075_v54 }
 0x17c   : > { %v1843_v40 = vshll.u32 %v1834_v63, 16  ;;  %v1240_v20 = vmul.f32 %v1223_v41, %v1128_v61  ;;  %v1847_v55 = vshrl.u32 %v1834_v63, 16  ;;  %v2211_v22 = vrot.slane %v3080_v43, 3 }
 0x17d   : > { %2156 = vmatpush.bf16.msra.mxu2 %v3203_v44  ;;  %v2091_v53 = vor.u32 %v2090_v10, %v2087_v14  ;;  %v2210_v11 = vrot.slane %v3076_v37, 3  ;;  %v4471_v10 = vld [vmem:[%s4556_s5] ss:$0 sm:$0xff] }
 0x17e   : > { %v1845_v51 = vrot.slane %v1843_v40, 1  ;;  %v3258_v30 = vpack.c.bf16 %v1240_v20, %v1239_v7 }
 0x17f   : > { %v2212_v34 = vsel %vm2209_vm5, %v2210_v11, %v2211_v22 }
 0x180   : > { %v1846_v52 = vsel %vm1504_vm8, %v1841_v13, %v1845_v51  ;;  %3266 = vst [vmem:[#allocation2 + $0x38] sm:$0xff] %v3258_v30   ;;  %vm1958_vm8 = vsmask.f32 5376  ;;  %v1849_v29 = vor.u32 %v1847_v55, %v1845_v51 }
 0x181   : > { %1908 = vmatmul.bf16.vlgmr.msrb.gmra.mxu3 %v1846_v52  ;;  %2157 = vmatpush.bf16.msra.mxu2 %v3202_v42  ;;  %v1975_v48 = vsel %vm1958_vm8, %v1966_v50, %v1974_v1  ;;  %v2100_v63 = vsel %vm1958_vm8, %v2091_v53, %v2099_v46 }
 0x185   : > { %2158 = vmatpush.bf16.msra.mxu2 %v3201_v3 }
 0x187   : > { %v1704_v57 = vld [vmem:[#allocation2 + $0x38] sm:$0x3] }
 0x188   : > { %v1727_v2 = vunpack.c.l.b16 %v1704_v57 }
 0x18a   : > { %v1729_v15 = vpack.c.b16 %v1727_v2, %v1727_v2 }
 0x18b   : > { %2034 = vmatmul.bf16.vlgmr.msra.gmra.mxu1 %v1975_v48 }
 0x18c   : > { %1793 = vmatmul.bf16.gmra.mxu2 %v1729_v15 }
 0x18e   : > { %v1364_v60 = vpop.f32.mrf.mxu1 }
 0x18f   : > { %1370 = vst [vmem:[#allocation3 + $0x10] sm:$0xf] %v1364_v60 }
 0x191   : > { %1913 = vmatmul.bf16.gmra.mxu3 %v1849_v29 }
 0x196   : > { %v1366_v36 = vpop.f32.mrf.mxu1  ;;  %v1469_v13 = vld [vmem:[#allocation3 + $0x10] sm:$0xf] }
 0x19b   : > { %2039 = vmatmul.bf16.gmra.mxu1 %v1974_v1 }
 0x19c   : > { %2159 = vmatmul.bf16.vlgmr.msra.gmra.mxu2 %v2100_v63 }
 0x19e   : > { %v1579_v24 = vpop.f32.mrf.mxu3 }
 0x1a1   : > { %2271 = vmatmul.bf16.vlgmr.msra.gmra.mxu3 %v2212_v34 }
 0x1a6   : > { %v1581_v61 = vpop.f32.mrf.mxu3 }
 0x1ac   : > { %2164 = vmatmul.bf16.gmra.mxu2 %v2099_v46 }
 0x1ae   : > { %v1584_v6 = vpop.f32.mrf.mxu3 }
 0x1b1   : > { %2276 = vmatmul.bf16.gmra.mxu3 %v2211_v22 }
 0x1b6   : > { %v1586_v40 = vpop.f32.mrf.mxu3 }
 0x1b8   : > { %v1458_v17 = vpop.f32.mrf.mxu2 }
 0x1b9   : > { %v1470_v12 = vadd.f32 %v1458_v17, %v4457_v5 }
 0x1bb   : > { %v1591_v62 = vadd.f32 %v1579_v24, %v1470_v12 }
 0x1c0   : > { %v1460_v41 = vpop.f32.mrf.mxu2 }
 0x1c1   : > { %v1471_v35 = vadd.f32 %v1460_v41, %v1361_v31 }
 0x1c3   : > { %v1592_v7 = vadd.f32 %v1581_v61, %v1471_v35 }
 0x1d4   : > { %v1684_v30 = vpop.f32.mrf.mxu1 }
 0x1d5   : > { %v1696_v26 = vadd.f32 %v1684_v30, %v1591_v62 }
 0x1d9   : > { %v1463_v20 = vpop.f32.mrf.mxu2 }
 0x1da   : > { %v1472_v51 = vadd.f32 %v1469_v13, %v1463_v20 }
 0x1dc   : > { %1475 = vst [vmem:[#allocation3 + $0x10] sm:$0xf] %v1472_v51  ;;  %v1686_v52 = vpop.f32.mrf.mxu1 }
 0x1dd   : > { %v1697_v29 = vadd.f32 %v1686_v52, %v1592_v7 }
 0x1e1   : > { %v1465_v44 = vpop.f32.mrf.mxu2 }
 0x1e3   : > { %v1590_v19 = vld [vmem:[#allocation3 + $0x10] sm:$0xf] }
 0x1e4   : > { %v1593_v8 = vadd.f32 %v1590_v19, %v1584_v6 }
 0x1e6   : > { %1596 = vst [vmem:[#allocation3 + $0x10] sm:$0xf] %v1593_v8 }
 0x1ed   : > { %v1695_v23 = vld [vmem:[#allocation3 + $0x10] sm:$0xf] }
 0x1f3   : > { %v1789_v58 = vpop.f32.mrf.mxu2 }
 0x1f4   : > { %v1801_v4 = vadd.f32 %v1789_v58, %v1696_v26 }
 0x1f8   : > { %v1689_v16 = vpop.f32.mrf.mxu1 }
 0x1f9   : > { %v1698_v42 = vadd.f32 %v1695_v23, %v1689_v16 }
 0x1fb   : > { %1701 = vst [vmem:[#allocation3 + $0x10] sm:$0xf] %v1698_v42  ;;  %v1791_v28 = vpop.f32.mrf.mxu2 }
 0x1fc   : > { %v1802_v33 = vadd.f32 %v1791_v28, %v1697_v29 }
 0x200   : > { %v1691_v5 = vpop.f32.mrf.mxu1 }
 0x202   : > { %v1800_v57 = vld [vmem:[#allocation3 + $0x10] sm:$0xf] }
 0x204   : > { %v1909_v25 = vpop.f32.mrf.mxu3 }
 0x205   : > { %v1921_v39 = vadd.f32 %v1909_v25, %v1801_v4 }
 0x208   : > { %v2035_v47 = vpop.f32.mrf.mxu1 }
 0x209   : > { %v2047_v0 = vadd.f32 %v2035_v47, %v1921_v39 }
 0x20c   : > { %v1911_v3 = vpop.f32.mrf.mxu3 }
 0x20d   : > { %v1922_v18 = vadd.f32 %v1911_v3, %v1802_v33 }
 0x20f   : > { %v1794_v50 = vpop.f32.mrf.mxu2 }
 0x210   : > { %v2037_v1 = vpop.f32.mrf.mxu1  ;;  %v1803_v31 = vadd.f32 %v1800_v57, %v1794_v50 }
 0x211   : > { %v2048_v54 = vadd.f32 %v2037_v1, %v1922_v18 }
 0x212   : > { %1806 = vst [vmem:[#allocation3 + $0x10] sm:$0xf] %v1803_v31 }
 0x214   : > { %v1914_v2 = vpop.f32.mrf.mxu3 }
 0x217   : > { %v1796_v15 = vpop.f32.mrf.mxu2 }
 0x218   : > { %v2040_v48 = vpop.f32.mrf.mxu1 }
 0x219   : > { %v1920_v49 = vld [vmem:[#allocation3 + $0x10] sm:$0xf] }
 0x21a   : > { %v1923_v27 = vadd.f32 %v1920_v49, %v1914_v2 }
 0x21c   : > { %v1916_v55 = vpop.f32.mrf.mxu3  ;;  %1926 = vst [vmem:[#allocation3 + $0x10] sm:$0xf] %v1923_v27 }
 0x21f   : > { %v2160_v60 = vpop.f32.mrf.mxu2 }
 0x220   : > { %v2042_v32 = vpop.f32.mrf.mxu1  ;;  %v2172_v59 = vadd.f32 %v2160_v60, %v2047_v0 }
 0x223   : > { %v2046_v9 = vld [vmem:[#allocation3 + $0x10] sm:$0xf] }
 0x224   : > { %v2272_v38 = vpop.f32.mrf.mxu3  ;;  %v2049_v21 = vadd.f32 %v2046_v9, %v2040_v48 }
 0x225   : > { %v2284_v45 = vadd.f32 %v2272_v38, %v2172_v59 }
 0x226   : > { %2052 = vst [vmem:[#allocation3 + $0x10] sm:$0xf] %v2049_v21 }
 0x227   : > { %2287 = vst [vmem:[#allocation3] sm:$0xff] %v2284_v45  ;;  %v2162_v56 = vpop.f32.mrf.mxu2 }
 0x228   : > { %v2173_v14 = vadd.f32 %v2162_v56, %v2048_v54 }
 0x22c   : > { %v2274_v43 = vpop.f32.mrf.mxu3 }
 0x22d   : > { %v2285_v46 = vadd.f32 %v2274_v43, %v2173_v14  ;;  %v2171_v22 = vld [vmem:[#allocation3 + $0x10] sm:$0xf] }
 0x22e   : > { %v2291_v36 = vld [vmem:[#allocation3] sm:$0xf] }
 0x22f   : > { %2288 = vst [vmem:[#allocation3 + $0x8] sm:$0xff] %v2285_v46  ;;  %v4474_v37 = vadd.f32 %v4471_v10, %v2291_v36  ;;  %v2165_v53 = vpop.f32.mrf.mxu2 }
 0x230   : > { %v2174_v11 = vadd.f32 %v2171_v22, %v2165_v53 }
 0x231   : > { %v2297_v63 = vmul.f32 0.70710677, %v4474_v37  ;;  %v2296_v22 = vmul.f32 0.5, %v4474_v37 }
 0x232   : > { %2177 = vst [vmem:[#allocation3 + $0x10] sm:$0xf] %v2174_v11 }
 0x233   : > { %v2298_v24 = vmul.f32 %v2297_v63, %v2297_v63 }
 0x234   : > { %v2277_v34 = vpop.f32.mrf.mxu3 }
 0x235   : > { %v2299_v61 = vmin.f32 %v2298_v24, 16.0 }
 0x236   : > { %v2342_v42 = vld [vmem:[#allocation3 + $0x5] sm:$0xf] }
 0x237   : > { %v2300_v6 = vmul.f32 2.1237322e-06, %v2299_v61  ;;  %v2311_v40 = vmul.f32 3.8918573e-05, %v2299_v61  ;;  %v2167_v17 = vpop.f32.mrf.mxu2  ;;  %v4478_v5 = vadd.f32 %v4471_v10, %v2342_v42 }
 0x239   : > { %v2301_v12 = vadd.f32 0.00028619796, %v2300_v6  ;;  %v2312_v41 = vadd.f32 0.001143296, %v2311_v40  ;;  %v2283_v35 = vld [vmem:[#allocation3 + $0x10] sm:$0xf] }
 0x23a   : > { %v2286_v13 = vadd.f32 %v2283_v35, %v2277_v34  ;;  %v4481_v28 = vmul.f32 0.70710677, %v4478_v5 }
 0x23b   : > { %v2302_v62 = vmul.f32 %v2301_v12, %v2299_v61  ;;  %v2313_v7 = vmul.f32 %v2312_v41, %v2299_v61 }
 0x23c   : > { %v2279_v20 = vpop.f32.mrf.mxu3  ;;  %2289 = vst [vmem:[#allocation3 + $0x10] sm:$0xf] %v2286_v13  ;;  %v2346_v3 = vmul.f32 %v4481_v28, %v4481_v28 }
 0x23d   : > { %v2303_v51 = vadd.f32 0.0036580483, %v2302_v62  ;;  %v2314_v44 = vadd.f32 0.014752088, %v2313_v7 }
 0x23e   : > { %v2347_v50 = vmin.f32 %v2346_v3, 16.0 }
 0x23f   : > { %v2315_v19 = vmul.f32 %v2314_v44, %v2299_v61  ;;  %v2304_v8 = vmul.f32 %v2303_v51, %v2299_v61 }
 0x240   : > { %v2348_v57 = vmul.f32 2.1237322e-06, %v2347_v50  ;;  %v2359_v31 = vmul.f32 3.8918573e-05, %v2347_v50 }
 0x241   : > { %v2316_v30 = vadd.f32 0.112945676, %v2315_v19  ;;  %v2305_v16 = vadd.f32 0.05243302, %v2304_v8 }
 0x242   : > { %v2349_v48 = vadd.f32 0.00028619796, %v2348_v57  ;;  %v2360_v15 = vadd.f32 0.001143296, %v2359_v31 }
 0x243   : > { %v2317_v52 = vmul.f32 %v2316_v30, %v2299_v61  ;;  %v2306_v25 = vmul.f32 %v2305_v16, %v2299_v61  ;;  %v2441_v3 = vld [vmem:[#allocation3 + $0xf] sm:$0xf] }
 0x244   : > { %v2350_v39 = vmul.f32 %v2349_v48, %v2347_v50  ;;  %v2361_v55 = vmul.f32 %v2360_v15, %v2347_v50  ;;  %v4501_v31 = vadd.f32 %v4471_v10, %v2441_v3 }
 0x245   : > { %v2318_v23 = vadd.f32 0.4994258, %v2317_v52  ;;  %v2307_v1 = vadd.f32 0.18741608, %v2306_v25 }
 0x246   : > { %v2351_v32 = vadd.f32 0.0036580483, %v2350_v39  ;;  %v2362_v60 = vadd.f32 0.014752088, %v2361_v55 }
 0x247   : > { %v2319_v58 = vmul.f32 %v2318_v23, %v2299_v61  ;;  %v2308_v26 = vmul.f32 %v2307_v1, %v2299_v61 }
 0x248   : > { %v2363_v18 = vmul.f32 %v2362_v60, %v2347_v50  ;;  %v2352_v21 = vmul.f32 %v2351_v32, %v2347_v50 }
 0x249   : > { %v2320_v47 = vadd.f32 1.0, %v2319_v58  ;;  %v2309_v27 = vadd.f32 1.1283791, %v2308_v26 }
 0x24a   : > { %v2364_v54 = vadd.f32 0.112945676, %v2363_v18  ;;  %v2353_v36 = vadd.f32 0.05243302, %v2352_v21 }
 0x24b   : > { %3346 = vrcp.f32 %v2320_v47  ;;  %v2330_v29 = vand.u32 2147483647, %v2320_v47  ;;  %v2332_v33 = vand.u32 2147483648, %v2320_v47  ;;  %vm2326_vm7 = vweird.f32 %v2320_v47 }
 0x24c   : > { %v2310_v38 = vmul.f32 %v2309_v27, %v2297_v63  ;;  %v2365_v43 = vmul.f32 %v2364_v54, %v2347_v50  ;;  %v2393_v63 = vld [vmem:[#allocation3 + $0xa] sm:$0xf]  ;;  %v2354_v6 = vmul.f32 %v2353_v36, %v2347_v50 }
 0x24d   : > { %v2333_v9 = vor.u32 1.1754944e-38, %v2332_v33  ;;  %vm2331_vm10 = vcmp.eq.f32.partialorder %v2330_v29, 8.507059e+37  ;;  %v4490_v34 = vadd.f32 %v4471_v10, %v2393_v63 }
 0x24e   : > { %v2366_v53 = vadd.f32 0.4994258, %v2365_v43  ;;  %v2355_v37 = vadd.f32 0.18741608, %v2354_v6 }
 0x24f   : > { %v4493_v17 = vmul.f32 0.70710677, %v4490_v34 }
 0x250   : > { %v2367_v24 = vmul.f32 %v2366_v53, %v2347_v50  ;;  %v2356_v13 = vmul.f32 %v2355_v37, %v2347_v50 }
 0x251   : > { %v3347_v2 = vpop.eup %3346  ;;  %v2397_v41 = vmul.f32 %v4493_v17, %v4493_v17 }
 0x252   : > { %v2322_v4 = vmul.f32 %v3347_v2, %v2320_v47  ;;  %vm2327_vm6 = vweird.f32 %v3347_v2  ;;  %v2368_v40 = vadd.f32 1.0, %v2367_v24  ;;  %v2357_v16 = vadd.f32 1.1283791, %v2356_v13 }
 0x253   : > { %vm2328_vm9 = vmor %vm2326_vm7, %vm2327_vm6  ;;  %v2398_v35 = vmin.f32 %v2397_v41, 16.0 }
 0x254   : > { %v2323_v49 = vsub.f32 1.0, %v2322_v4  ;;  %3348 = vrcp.f32 %v2368_v40  ;;  %v2378_v23 = vand.u32 2147483647, %v2368_v40  ;;  %v2380_v42 = vand.u32 2147483648, %v2368_v40 }
 0x255   : > { %v2399_v62 = vmul.f32 2.1237322e-06, %v2398_v35  ;;  %v2410_v7 = vmul.f32 3.8918573e-05, %v2398_v35  ;;  %vm2374_vm12 = vweird.f32 %v2368_v40  ;;  %v2358_v50 = vmul.f32 %v2357_v16, %v4481_v28 }
 0x256   : > { %v2324_v0 = vmul.f32 %v3347_v2, %v2323_v49  ;;  %vm2379_vm14 = vcmp.eq.f32.partialorder %v2378_v23, 8.507059e+37  ;;  %v4505_v49 = vmul.f32 0.70710677, %v4501_v31  ;;  %v2344_v28 = vmul.f32 0.5, %v4478_v5 }
 0x257   : > { %v2400_v44 = vadd.f32 0.00028619796, %v2399_v62  ;;  %v2411_v19 = vadd.f32 0.001143296, %v2410_v7 }
 0x258   : > { %v2325_v59 = vadd.f32 %v3347_v2, %v2324_v0  ;;  %v2445_v27 = vmul.f32 %v4505_v49, %v4505_v49 }
 0x259   : > { %v2401_v30 = vmul.f32 %v2400_v44, %v2398_v35  ;;  %v2412_v52 = vmul.f32 %v2411_v19, %v2398_v35 }
 0x25a   : > { %v2329_v45 = vsel %vm2328_vm9, %v3347_v2, %v2325_v59  ;;  %v3349_v20 = vpop.eup %3348  ;;  %v2381_v2 = vor.u32 1.1754944e-38, %v2380_v42  ;;  %v2446_v0 = vmin.f32 %v2445_v27, 16.0 }
 0x25b   : > { %v2334_v56 = vsel %vm2331_vm10, %v2333_v9, %v2329_v45  ;;  %v2370_v51 = vmul.f32 %v3349_v20, %v2368_v40  ;;  %vm2375_vm11 = vweird.f32 %v3349_v20  ;;  %v2402_v25 = vadd.f32 0.0036580483, %v2401_v30 }
 0x25c   : > { %v2335_v14 = vmul.f32 %v2334_v56, %v2310_v38  ;;  %v2413_v47 = vadd.f32 0.014752088, %v2412_v52  ;;  %vm2376_vm13 = vmor %vm2374_vm12, %vm2375_vm11  ;;  %v2447_v59 = vmul.f32 2.1237322e-06, %v2446_v0  ;;  %v2458_v18 = vmul.f32 3.8918573e-05, %v2446_v0 }
 0x25d   : > { %v2371_v8 = vsub.f32 1.0, %v2370_v51  ;;  %v2403_v4 = vmul.f32 %v2402_v25, %v2398_v35  ;;  %v2395_v25 = vmul.f32 0.5, %v4490_v34 }
 0x25e   : > { %v3113_v46 = vclamps-f32 %v2335_v14, 1.0  ;;  %v2414_v57 = vmul.f32 %v2413_v47, %v2398_v35  ;;  %v2448_v21 = vadd.f32 0.00028619796, %v2447_v59  ;;  %v2459_v54 = vadd.f32 0.001143296, %v2458_v18 }
 0x25f   : > { %v2372_v58 = vmul.f32 %v3349_v20, %v2371_v8  ;;  %v2404_v10 = vadd.f32 0.05243302, %v2403_v4 }
 0x260   : > { %v2338_v11 = vadd.f32 1.0, %v3113_v46  ;;  %v2415_v48 = vadd.f32 0.112945676, %v2414_v57  ;;  %v2449_v14 = vmul.f32 %v2448_v21, %v2446_v0  ;;  %v2460_v43 = vmul.f32 %v2459_v54, %v2446_v0 }
 0x261   : > { %v2373_v1 = vadd.f32 %v3349_v20, %v2372_v58  ;;  %v2405_v9 = vmul.f32 %v2404_v10, %v2398_v35 }
 0x262   : > { %v2339_v61 = vmul.f32 %v2338_v11, %v2296_v22  ;;  %v2416_v55 = vmul.f32 %v2415_v48, %v2398_v35  ;;  %v2461_v53 = vadd.f32 0.014752088, %v2460_v43  ;;  %v2450_v22 = vadd.f32 0.0036580483, %v2449_v14 }
 0x263   : > { %v2377_v26 = vsel %vm2376_vm13, %v3349_v20, %v2373_v1  ;;  %v2406_v36 = vadd.f32 0.18741608, %v2405_v9 }
 0x264   : > { %v2340_v12 = vpack.c.bf16 %v2339_v61, %v2339_v61  ;;  %v2382_v15 = vsel %vm2379_vm14, %v2381_v2, %v2377_v26  ;;  %v2417_v33 = vadd.f32 0.4994258, %v2416_v55  ;;  %v2462_v5 = vmul.f32 %v2461_v53, %v2446_v0 }
 0x265   : > { %v2383_v39 = vmul.f32 %v2382_v15, %v2358_v50  ;;  %v2407_v24 = vmul.f32 %v2406_v36, %v2398_v35  ;;  %v2451_v6 = vmul.f32 %v2450_v22, %v2446_v0 }
 0x266   : > { %2341 = vst [vmem:[%s4497_s14] sm:$0x3] %v2340_v12  ;;  %v2418_v60 = vmul.f32 %v2417_v33, %v2398_v35  ;;  %v2463_v61 = vadd.f32 0.112945676, %v2462_v5 }
 0x267   : > { %v3114_v29 = vclamps-f32 %v2383_v39, 1.0  ;;  %v2408_v41 = vadd.f32 1.1283791, %v2407_v24  ;;  %v2452_v13 = vadd.f32 0.05243302, %v2451_v6 }
 0x268   : > { %v2419_v45 = vadd.f32 1.0, %v2418_v60  ;;  %v2464_v12 = vmul.f32 %v2463_v61, %v2446_v0 }
 0x269   : > { %v2386_v32 = vadd.f32 1.0, %v3114_v29  ;;  %v2409_v8 = vmul.f32 %v2408_v41, %v4493_v17  ;;  %v2453_v16 = vmul.f32 %v2452_v13, %v2446_v0 }
 0x26a   : > { %3350 = vrcp.f32 %v2419_v45  ;;  %v2431_v37 = vand.u32 2147483648, %v2419_v45  ;;  %v2429_v7 = vand.u32 2147483647, %v2419_v45  ;;  %v2465_v20 = vadd.f32 0.4994258, %v2464_v12 }
 0x26b   : > { %v2387_v38 = vmul.f32 %v2386_v32, %v2344_v28  ;;  %vm2425_vm0 = vweird.f32 %v2419_v45  ;;  %v2454_v58 = vadd.f32 0.18741608, %v2453_v16 }
 0x26c   : > { %v2466_v44 = vmul.f32 %v2465_v20, %v2446_v0  ;;  %v2432_v19 = vor.u32 1.1754944e-38, %v2431_v37  ;;  %vm2430_vm2 = vcmp.eq.f32.partialorder %v2429_v7, 8.507059e+37 }
 0x26d   : > { %v2388_v56 = vpack.c.bf16 %v2387_v38, %v2387_v38  ;;  %v2455_v57 = vmul.f32 %v2454_v58, %v2446_v0  ;;  %v2443_v0 = vmul.f32 0.5, %v4501_v31 }
 0x26e   : > { %v2467_v30 = vadd.f32 1.0, %v2466_v44 }
 0x26f   : > { %v2390_v46 = vrot.slane %v2388_v56, 6  ;;  %v2456_v4 = vadd.f32 1.1283791, %v2455_v57 }
 0x270   : > { %v3351_v11 = vpop.eup %3350  ;;  %3352 = vrcp.f32 %v2467_v30  ;;  %v2479_v17 = vand.u32 2147483648, %v2467_v30  ;;  %v2477_v15 = vand.u32 2147483647, %v2467_v30  ;;  %vm2473_vm4 = vweird.f32 %v2467_v30 }
 0x271   : > { %2392 = vst [vmem:[%s4497_s14] sm:$0xc] %v2390_v46  ;;  %v2421_v63 = vmul.f32 %v3351_v11, %v2419_v45  ;;  %vm2426_vm15 = vweird.f32 %v3351_v11  ;;  %v2457_v34 = vmul.f32 %v2456_v4, %v4505_v49 }
 0x272   : > { %vm2427_vm1 = vmor %vm2425_vm0, %vm2426_vm15  ;;  %v2480_v55 = vor.u32 1.1754944e-38, %v2479_v17  ;;  %vm2478_vm5 = vcmp.eq.f32.partialorder %v2477_v15, 8.507059e+37 }
 0x273   : > { %v2422_v40 = vsub.f32 1.0, %v2421_v63 }
 0x275   : > { %v2423_v62 = vmul.f32 %v3351_v11, %v2422_v40 }
 0x276   : > { %v3353_v3 = vpop.eup %3352 }
 0x277   : > { %v2424_v51 = vadd.f32 %v3351_v11, %v2423_v62  ;;  %v2469_v50 = vmul.f32 %v3353_v3, %v2467_v30  ;;  %vm2474_vm3 = vweird.f32 %v3353_v3 }
 0x278   : > { %vm2475_vm8 = vmor %vm2473_vm4, %vm2474_vm3 }
 0x279   : > { %v2428_v35 = vsel %vm2427_vm1, %v3351_v11, %v2424_v51  ;;  %v2470_v26 = vsub.f32 1.0, %v2469_v50 }
 0x27a   : > { %v2433_v52 = vsel %vm2430_vm2, %v2432_v19, %v2428_v35 }
 0x27b   : > { %v2434_v23 = vmul.f32 %v2433_v52, %v2409_v8  ;;  %v2471_v48 = vmul.f32 %v3353_v3, %v2470_v26 }
 0x27d   : > { %v3115_v42 = vclamps-f32 %v2434_v23, 1.0  ;;  %v2472_v39 = vadd.f32 %v3353_v3, %v2471_v48 }
 0x27f   : > { %v2437_v47 = vadd.f32 1.0, %v3115_v42  ;;  %v2476_v27 = vsel %vm2475_vm8, %v3353_v3, %v2472_v39 }
 0x280   : > { %v2481_v29 = vsel %vm2478_vm5, %v2480_v55, %v2476_v27 }
 0x281   : > { %v2438_v1 = vmul.f32 %v2437_v47, %v2395_v25  ;;  %v2482_v10 = vmul.f32 %v2481_v29, %v2457_v34 }
 0x283   : > { %v2439_v2 = vpack.c.bf16 %v2438_v1, %v2438_v1  ;;  %v3116_v33 = vclamps-f32 %v2482_v10, 1.0 }
 0x285   : > { %2440 = vst [vmem:[%s4497_s14 + $0x4] sm:$0x3] %v2439_v2  ;;  %v2485_v28 = vadd.f32 1.0, %v3116_v33 }
 0x287   : > { %v2486_v32 = vmul.f32 %v2485_v28, %v2443_v0 }
 0x289   : > { %v2487_v49 = vpack.c.bf16 %v2486_v32, %v2486_v32 }
 0x28b   : > { %v2489_v60 = vrot.slane %v2487_v49, 6 }
 0x28d   : > { %2491 = vst [vmem:[%s4497_s14 + $0x4] sm:$0xc] %v2489_v60 }
 0x28e   : > { %3382 = shalt.err (!%p3379_p3)
}
 0x28f   : > { %s3420_s13 = smov 64   ;;  %s3421_s14 = smov 4  }
 0x290   : > { %3267 = dma.vmem_to_hbm [thread:$0]  (%p3495_p5), %s2506_s19, 128, %s2508_s20, %s2493_s26, %s3420_s13, %s3420_s13, %s3421_s14  }
 0x291 PF: > { %p3273_p4 = scmp.ge.s32.totalorder %s3417_s24, 2  ;;  %s2522_s15 = sand.u32 1, %s3405_s21  }
 0x292   : > { %s2523_s16 = scalar_lea.sflag [#allocation5], %s2522_s15 }
 0x293   : > { %p3270_p7 = pnand %p3273_p4, %p3499_p6 }
 0x295   : > { %p3271_p8 = pneg %p3270_p7 }
 0x297   : > { %3400 = dma.done.wait (%p3271_p8), %s2523_s16, 128  }
 0x298   : > { %3402 = vsyncadd (%p3271_p8), %s2523_s16, 4294967168  ;;  %p16_p9 = scmp.ge.s32.totalorder %s3482_s27, 4   ;;  %s4574_s21 = smov %s3409_s22 }
 0x299   : > { %s4575_s22 = smov %s3413_s23  ;;  %s4576_s23 = smov %s3493_s30 }
 0x29a   : > { %s4577_s24 = smov %s3482_s27  ;;  %18 = sbr.rel (!%p16_p9) target bundleno = 3 (0x3), region = 87 }
 0x29f   :  { %2529 = vsyncpa [#allocation5], 1 }
 0x2a0   :  { %2531 = vsyncpa [#allocation5 + $0x1], 1 }

</bundles_post_ra>
